<compile_context>
chip_gen: v6e
topology: v6e:2x2x1
jax: 0.10.0
libtpu: 0.0.40
codegen_flags: <defaults>
</compile_context>

<pallas_src>
import jax
import jax.numpy as jnp
from jax.experimental import pallas as pl
from jax.experimental.pallas import tpu as pltpu


def _round_up(v, m):
    return ((v + m - 1) // m) * m


def _tile_n(nout, tn_max=512):
    """Output-channel tiling: tn and the padded column count (multiple of tn)."""
    npad = _round_up(nout, 128)
    tn = min(tn_max, npad)
    return tn, _round_up(npad, tn)


# --------------------------- single-K tiled matmul + bias --------------------

def _matmul_bias_kernel(x_ref, w_ref, b_ref, o_ref):
    o_ref[...] = (jnp.dot(x_ref[...], w_ref[...],
                          preferred_element_type=jnp.float32)
                  + b_ref[...]).astype(o_ref.dtype)


def matmul_bias(x, w, b, *, tn, out_dtype=jnp.bfloat16, tm_max=256):
    """x:(M,K) bf16 @ w:(K,Np) bf16 + b:(1,Np) f32 -> (Mp,Np).  tk == K."""
    M, K = x.shape
    K2, Np = w.shape
    assert K == K2 and Np % tn == 0
    tm = min(tm_max, _round_up(M, 8))
    Mp = _round_up(M, tm)
    if Mp != M:
        x = jnp.pad(x, ((0, Mp - M), (0, 0)))

    cost = pl.CostEstimate(
        flops=2 * Mp * Np * K,
        transcendentals=0,
        bytes_accessed=Mp * K * 2 + K * Np * 2 + Mp * Np * 2 + Np * 4)

    return pl.pallas_call(
        _matmul_bias_kernel,
        out_shape=jax.ShapeDtypeStruct((Mp, Np), out_dtype),
        grid=(Mp // tm, Np // tn),
        in_specs=[
            pl.BlockSpec((tm, K), lambda i, j: (i, 0)),
            pl.BlockSpec((K, tn), lambda i, j: (0, j)),
            pl.BlockSpec((1, tn), lambda i, j: (0, j)),
        ],
        out_specs=pl.BlockSpec((tm, tn), lambda i, j: (i, j)),
        compiler_params=pltpu.CompilerParams(
            dimension_semantics=("parallel", "parallel")),
        cost_estimate=cost,
    )(x, w, b)


# --------- fused grouped xcorr (shift accumulation) + 1x1 adjust -------------

def xcorr_adjust(feat, kern, adj, bvec, *, shifts, Q):
    """
    feat: (N, 2C, Sp)    bf16, channel-major fused search feature, lane-padded
    kern: (N, S, KR, 2C) bf16, per-shift fused (reg|cls) kernels, row-padded
    adj:  (KR, KR)       f32,  1x1-adjust on reg rows + identity on cls rows
    bvec: (KR, 1)        f32
    out:  (N, KR, Q)     f32,  rows [0,4A)=adjusted reg, [4A,6A)=cls
    """
    N, C2, Sp = feat.shape
    _, S, KR, _ = kern.shape
    assert S == len(shifts)

    def kernel(feat_ref, kern_ref, adj_ref, bvec_ref, out_ref):
        acc = jnp.zeros((KR, Q), jnp.float32)
        for idx, s in enumerate(shifts):          # static unroll over Hk*Wk shifts
            k_s = kern_ref[0, idx, :, :]          # (KR, 2C) bf16
            f_s = feat_ref[0, :, s:s + Q]         # (2C, Q)  bf16, static lane offset
            acc = acc + jnp.dot(k_s, f_s, preferred_element_type=jnp.float32)
        # fused 1x1 adjust (reg rows) + identity (cls rows), all in f32
        out_ref[0] = (jnp.dot(adj_ref[...], acc,
                              preferred_element_type=jnp.float32)
                      + bvec_ref[...])

    cost = pl.CostEstimate(
        flops=N * (2 * S * KR * C2 * Q + 2 * KR * KR * Q),
        transcendentals=0,
        bytes_accessed=(feat.size * 2 + kern.size * 2 + N * KR * Q * 4
                        + adj.size * 4 + bvec.size * 4))

    return pl.pallas_call(
        kernel,
        out_shape=jax.ShapeDtypeStruct((N, KR, Q), jnp.float32),
        grid=(N,),
        in_specs=[
            pl.BlockSpec((1, C2, Sp), lambda n: (n, 0, 0)),
            pl.BlockSpec((1, S, KR, C2), lambda n: (n, 0, 0, 0)),
            pl.BlockSpec((KR, KR), lambda n: (0, 0)),
            pl.BlockSpec((KR, 1), lambda n: (0, 0)),
        ],
        out_specs=pl.BlockSpec((1, KR, Q), lambda n: (n, 0, 0)),
        compiler_params=pltpu.CompilerParams(
            dimension_semantics=("parallel",)),
        cost_estimate=cost,
    )(feat, kern, adj, bvec)


# ------------------------------- JAX glue ------------------------------------

def im2col_nhwc(x, kh, kw):
    """NHWC -> (N, Ho, Wo, kh*kw*C) valid-conv patches; feature order (dy,dx,c)."""
    N, H, W, C = x.shape
    Ho, Wo = H - kh + 1, W - kw + 1
    cols = [x[:, dy:dy + Ho, dx:dx + Wo, :]
            for dy in range(kh) for dx in range(kw)]
    p = jnp.stack(cols, axis=3)                 # (N, Ho, Wo, kh*kw, C)
    return p.reshape(N, Ho, Wo, kh * kw * C)


# ----------------------------- RpnHead module --------------------------------

def init_rpn_head_params(key, in_channels, out_channels=256, num_anchor=5):
    """Raw parameters in PyTorch Conv2d layout (Cout, Cin, kh, kw)."""
    ks = jax.random.split(key, 10)

    def conv_params(kw_key, kb_key, cout, cin, k):
        fan_in = cin * k * k
        scale = 1.0 / float(fan_in) ** 0.5
        w = jax.random.uniform(kw_key, (cout, cin, k, k), jnp.float32, -scale, scale)
        b = jax.random.uniform(kb_key, (cout,), jnp.float32, -scale, scale)
        return w, b

    return {
        "template_cls": conv_params(ks[0], ks[1], out_channels * num_anchor * 2, in_channels, 3),
        "template_reg": conv_params(ks[2], ks[3], out_channels * num_anchor * 4, in_channels, 3),
        "search_cls": conv_params(ks[4], ks[5], out_channels, in_channels, 3),
        "search_reg": conv_params(ks[6], ks[7], out_channels, in_channels, 3),
        "adjust": conv_params(ks[8], ks[9], num_anchor * 4, num_anchor * 4, 1),
    }


def prepare_rpn_head_params(params, out_channels, num_anchor):
    """One-time weight prep: flatten, fuse cls+reg, pad to tile multiples, cast."""
    C, A = out_channels, num_anchor

    def flat_w(w):  # (Cout, Cin, kh, kw) -> (kh*kw*Cin, Cout), feature order (dy,dx,c)
        cout, cin, kh, kw = w.shape
        return w.transpose(2, 3, 1, 0).reshape(kh * kw * cin, cout)

    def pack(ws, bs):
        w = jnp.concatenate([flat_w(wi) for wi in ws], axis=1)
        b = jnp.concatenate(bs)
        nout = w.shape[1]
        _, npad = _tile_n(nout)
        w = jnp.pad(w, ((0, 0), (0, npad - nout))).astype(jnp.bfloat16)
        b = jnp.pad(b, ((0, npad - nout),)).astype(jnp.float32).reshape(1, npad)
        return w, b

    w_sc, b_sc = params["search_cls"]
    w_sr, b_sr = params["search_reg"]
    w_tc, b_tc = params["template_cls"]
    w_tr, b_tr = params["template_reg"]
    w_ad, b_ad = params["adjust"]

    w_search, b_search = pack([w_sc, w_sr], [b_sc, b_sr])
    w_template, b_template = pack([w_tc, w_tr], [b_tc, b_tr])

    # fused adjust matrix: rows [0,4A) = 1x1 adjust conv, rows [4A,6A) = identity.
    KR = _round_up(6 * A, 8)
    adj = jnp.zeros((KR, KR), jnp.float32)
    adj = adj.at[:4 * A, :4 * A].set(w_ad.reshape(4 * A, 4 * A).astype(jnp.float32))
    diag = jnp.arange(2 * A)
    adj = adj.at[4 * A + diag, 4 * A + diag].set(1.0)
    bvec = jnp.zeros((KR, 1), jnp.float32).at[:4 * A, 0].set(b_ad.astype(jnp.float32))

    return {"w_search": w_search, "b_search": b_search,
            "w_template": w_template, "b_template": b_template,
            "adjust": adj, "adjust_bias": bvec}


def rpn_head_forward(prepared, z_f, x_f, out_channels, num_anchor):
    C, A = out_channels, num_anchor
    N, Cin, _, _ = x_f.shape

    # NCHW -> NHWC and cast to bf16 ONCE at the module boundary.
    x_nhwc = jnp.transpose(x_f, (0, 2, 3, 1)).astype(jnp.bfloat16)
    z_nhwc = jnp.transpose(z_f, (0, 2, 3, 1)).astype(jnp.bfloat16)

    # ---- fused search_cls + search_reg 3x3 conv: one matmul (tk = K) ----
    xp = im2col_nhwc(x_nhwc, 3, 3)
    Hs, Ws = xp.shape[1], xp.shape[2]
    Ms = N * Hs * Ws
    tn_s, _ = _tile_n(2 * C)
    search = matmul_bias(xp.reshape(Ms, 9 * Cin),
                         prepared["w_search"], prepared["b_search"], tn=tn_s)
    search = search[:Ms, :2 * C]                       # (Ms, 2C) bf16; ch [0,C)=cls, [C,2C)=reg

    # ---- fused template_cls + template_reg 3x3 conv: one matmul (tk = K) ----
    zp = im2col_nhwc(z_nhwc, 3, 3)
    Hk, Wk = zp.shape[1], zp.shape[2]
    Mt = N * Hk * Wk
    tn_t, _ = _tile_n(6 * A * C)
    templ = matmul_bias(zp.reshape(Mt, 9 * Cin),
                        prepared["w_template"], prepared["b_template"], tn=tn_t)
    templ = templ[:Mt, :6 * A * C].reshape(N, Hk * Wk, 6 * A * C)

    # ---- build per-shift fused (reg|cls) kernels with block-channel structure ----
    KR = _round_up(6 * A, 8)
    S = Hk * Wk
    cls_k = templ[..., :2 * A * C].reshape(N, S, 2 * A, C)
    reg_k = templ[..., 2 * A * C:].reshape(N, S, 4 * A, C)
    cls_k = jnp.pad(cls_k, ((0, 0), (0, 0), (0, 0), (0, C)))   # cls uses feature ch [0, C)
    reg_k = jnp.pad(reg_k, ((0, 0), (0, 0), (0, 0), (C, 0)))   # reg uses feature ch [C, 2C)
    kern = jnp.concatenate([reg_k, cls_k], axis=2)             # rows: reg first, then cls
    kern = jnp.pad(kern, ((0, 0), (0, 0), (0, KR - 6 * A), (0, 0)))  # (N, S, KR, 2C)

    # ---- channel-major, flattened, lane-padded search feature (read once) ----
    Ho, Wo = Hs - Hk + 1, Ws - Wk + 1
    Q = _round_up(Ho * Ws, 128)                    # lane-dense output width
    s_max = (Hk - 1) * Ws + (Wk - 1)
    Sp = _round_up(s_max + Q, 128)
    feat = search.reshape(N, Hs * Ws, 2 * C).transpose(0, 2, 1)    # (N, 2C, Hs*Ws)
    feat = jnp.pad(feat, ((0, 0), (0, 0), (0, Sp - Hs * Ws)))

    shifts = tuple(dy * Ws + dx for dy in range(Hk) for dx in range(Wk))
    out = xcorr_adjust(feat, kern, prepared["adjust"], prepared["adjust_bias"],
                       shifts=shifts, Q=Q)                         # (N, KR, Q) f32

    # valid-window extraction + final views (small data, pure XLA glue)
    maps = out[:, :, :Ho * Ws].reshape(N, KR, Ho, Ws)[:, :, :, :Wo]  # (N, KR, Ho, Wo)
    pred_reg = maps[:, :4 * A].reshape(N, 4, A, Ho, Wo)
    pred_cls = maps[:, 4 * A:6 * A].reshape(N, 2, A, Ho, Wo)
    return pred_cls, pred_reg


# ------------------------- pure-JAX f32 reference -----------------------------

def _conv2d_ref(x, w, b=None, groups=1):
    out = jax.lax.conv_general_dilated(
        x, w, window_strides=(1, 1), padding="VALID",
        dimension_numbers=("NCHW", "OIHW", "NCHW"),
        feature_group_count=groups, precision=jax.lax.Precision.HIGHEST)
    if b is not None:
        out = out + b.reshape(1, -1, 1, 1)
    return out


def rpn_head_reference(params, z_f, x_f, out_channels, num_anchor):
    C = out_channels
    N = x_f.shape[0]
    cls_feature = _conv2d_ref(x_f, *params["search_cls"])
    reg_feature = _conv2d_ref(x_f, *params["search_reg"])
    cls_kernel = _conv2d_ref(z_f, *params["template_cls"])
    reg_kernel = _conv2d_ref(z_f, *params["template_reg"])
    cls_kernel = cls_kernel.reshape(-1, C, *cls_kernel.shape[2:])
    reg_kernel = reg_kernel.reshape(-1, C, *reg_kernel.shape[2:])

    def _xcorr(f, k):
        n, ch = f.shape[:2]
        px = f.reshape(1, n * ch, *f.shape[2:])
        po = _conv2d_ref(px, k, groups=n)
        return po.reshape(n, -1, *po.shape[2:])

    pred_cls = _xcorr(cls_feature, cls_kernel)
    pred_reg = _xcorr(reg_feature, reg_kernel)
    pred_reg = _conv2d_ref(pred_reg, *params["adjust"])
    pred_cls = pred_cls.reshape(N, 2, -1, *pred_cls.shape[2:])
    pred_reg = pred_reg.reshape(N, 4, -1, *pred_reg.shape[2:])
    return pred_cls, pred_reg


# --------------------------------- main ---------------------------------------

if __name__ == "__main__":
    key = jax.random.PRNGKey(0)
    in_channels, out_channels, num_anchor = 8, 32, 5
    N = 2
    kz, kx, kp = jax.random.split(key, 3)

    z_f = jax.random.normal(kz, (N, in_channels, 6, 6), jnp.float32)    # template feature
    x_f = jax.random.normal(kx, (N, in_channels, 16, 16), jnp.float32)  # search feature

    params = init_rpn_head_params(kp, in_channels, out_channels, num_anchor)
    prepared = prepare_rpn_head_params(params, out_channels, num_anchor)

    fwd = jax.jit(rpn_head_forward, static_argnums=(3, 4))
    pred_cls, pred_reg = fwd(prepared, z_f, x_f, out_channels, num_anchor)
    jax.block_until_ready((pred_cls, pred_reg))

    # expected output spatial size: (Hx-2) - (Hz-2) + 1 = 16 - 6 + 1 = 11
    H = 16 - 6 + 1
    assert pred_cls.shape == (N, 2, num_anchor, H, H), pred_cls.shape
    assert pred_reg.shape == (N, 4, num_anchor, H, H), pred_reg.shape
    assert pred_cls.dtype == jnp.float32 and pred_reg.dtype == jnp.float32

    # numerical check vs. f32 reference (bf16 MXU path -> generous tolerance)
    ref_cls, ref_reg = rpn_head_reference(params, z_f, x_f, out_channels, num_anchor)

    def max_rel_err(a, b):
        return float(jnp.max(jnp.abs(a - b)) / (jnp.max(jnp.abs(b)) + 1e-6))

    err_cls = max_rel_err(pred_cls, ref_cls)
    err_reg = max_rel_err(pred_reg, ref_reg)
    assert err_cls < 3e-2, f"cls mismatch: {err_cls}"
    assert err_reg < 3e-2, f"reg mismatch: {err_reg}"

    print("KERNEL_OK")
</pallas_src>

<mosaic_0001>
module attributes {stable_mosaic.version = 11 : i64} {
  func.func @_matmul_bias_kernel(%arg0: i32, %arg1: i32, %arg2: memref<256x72xbf16, #tpu.memory_space<vmem>>, %arg3: memref<72x128xbf16, #tpu.memory_space<vmem>>, %arg4: memref<1x128xf32, #tpu.memory_space<vmem>>, %arg5: memref<256x128xbf16, #tpu.memory_space<vmem>>) attributes {dimension_semantics = [#tpu.dimension_semantics<parallel>, #tpu.dimension_semantics<parallel>], iteration_bounds = array<i64: 2, 1>, scalar_prefetch = 0 : i64, scratch_operands = 0 : i64, tpu.core_type = #tpu.core_type<tc>, window_params = [{transform_indices = @transform_0, window_bounds = array<i64: 256, 72>}, {transform_indices = @transform_1, window_bounds = array<i64: 72, 128>}, {transform_indices = @transform_2, window_bounds = array<i64: 1, 128>}, {transform_indices = @transform_3, window_bounds = array<i64: 256, 128>}]} {
    %c0 = arith.constant 0 : index
    %c0_0 = arith.constant 0 : index
    %0 = vector.load %arg2[%c0, %c0_0] : memref<256x72xbf16, #tpu.memory_space<vmem>>, vector<256x72xbf16>
    %c0_1 = arith.constant 0 : index
    %c0_2 = arith.constant 0 : index
    %1 = vector.load %arg3[%c0_1, %c0_2] : memref<72x128xbf16, #tpu.memory_space<vmem>>, vector<72x128xbf16>
    %cst = arith.constant dense<0.000000e+00> : vector<256x128xf32>
    %2 = tpu.matmul %0, %1, %cst {dimension_numbers = #tpu.dot_dimension_numbers<[1], [0], [0], [1], [0, 0, 1, 1], [], []>} : vector<256x72xbf16>, vector<72x128xbf16>, vector<256x128xf32> -> vector<256x128xf32>
    %c0_3 = arith.constant 0 : index
    %c0_4 = arith.constant 0 : index
    %3 = vector.load %arg4[%c0_3, %c0_4] : memref<1x128xf32, #tpu.memory_space<vmem>>, vector<1x128xf32>
    %4 = vector.broadcast %3 : vector<1x128xf32> to vector<256x128xf32>
    %5 = arith.addf %2, %4 : vector<256x128xf32>
    %6 = arith.truncf %5 : vector<256x128xf32> to vector<256x128xbf16>
    %c0_5 = arith.constant 0 : index
    %c0_6 = arith.constant 0 : index
    %7 = vector.load %arg5[%c0_5, %c0_6] : memref<256x128xbf16, #tpu.memory_space<vmem>>, vector<256x128xbf16>
    tpu.vector_store %arg5[%c0_5, %c0_6], %6 {strides = array<i32>} : memref<256x128xbf16, #tpu.memory_space<vmem>>, vector<256x128xbf16>,
    return
  }
  func.func @transform_0(%arg0: i32, %arg1: i32) -> (i32, i32) {
    %c0_i32 = arith.constant 0 : i32
    %c0_i32_0 = arith.constant 0 : i32
    return %arg0, %c0_i32 : i32, i32
  }
  func.func @transform_1(%arg0: i32, %arg1: i32) -> (i32, i32) {
    %c0_i32 = arith.constant 0 : i32
    %c0_i32_0 = arith.constant 0 : i32
    return %c0_i32, %arg1 : i32, i32
  }
  func.func @transform_2(%arg0: i32, %arg1: i32) -> (i32, i32) {
    %c0_i32 = arith.constant 0 : i32
    %c0_i32_0 = arith.constant 0 : i32
    return %c0_i32, %arg1 : i32, i32
  }
  func.func @transform_3(%arg0: i32, %arg1: i32) -> (i32, i32) {
    %c0_i32 = arith.constant 0 : i32
    return %arg0, %arg1 : i32, i32
  }
}

module attributes {stable_mosaic.version = 11 : i64} {
  func.func @_matmul_bias_kernel(%arg0: i32, %arg1: i32, %arg2: memref<32x72xbf16, #tpu.memory_space<vmem>>, %arg3: memref<72x512xbf16, #tpu.memory_space<vmem>>, %arg4: memref<1x512xf32, #tpu.memory_space<vmem>>, %arg5: memref<32x512xbf16, #tpu.memory_space<vmem>>) attributes {dimension_semantics = [#tpu.dimension_semantics<parallel>, #tpu.dimension_semantics<parallel>], iteration_bounds = array<i64: 1, 2>, scalar_prefetch = 0 : i64, scratch_operands = 0 : i64, tpu.core_type = #tpu.core_type<tc>, window_params = [{transform_indices = @transform_0, window_bounds = array<i64: 32, 72>}, {transform_indices = @transform_1, window_bounds = array<i64: 72, 512>}, {transform_indices = @transform_2, window_bounds = array<i64: 1, 512>}, {transform_indices = @transform_3, window_bounds = array<i64: 32, 512>}]} {
    %c0 = arith.constant 0 : index
    %c0_0 = arith.constant 0 : index
    %0 = vector.load %arg2[%c0, %c0_0] : memref<32x72xbf16, #tpu.memory_space<vmem>>, vector<32x72xbf16>
    %c0_1 = arith.constant 0 : index
    %c0_2 = arith.constant 0 : index
    %1 = vector.load %arg3[%c0_1, %c0_2] : memref<72x512xbf16, #tpu.memory_space<vmem>>, vector<72x512xbf16>
    %cst = arith.constant dense<0.000000e+00> : vector<32x512xf32>
    %2 = tpu.matmul %0, %1, %cst {dimension_numbers = #tpu.dot_dimension_numbers<[1], [0], [0], [1], [0, 0, 1, 1], [], []>} : vector<32x72xbf16>, vector<72x512xbf16>, vector<32x512xf32> -> vector<32x512xf32>
    %c0_3 = arith.constant 0 : index
    %c0_4 = arith.constant 0 : index
    %3 = vector.load %arg4[%c0_3, %c0_4] : memref<1x512xf32, #tpu.memory_space<vmem>>, vector<1x512xf32>
    %4 = vector.broadcast %3 : vector<1x512xf32> to vector<32x512xf32>
    %5 = arith.addf %2, %4 : vector<32x512xf32>
    %6 = arith.truncf %5 : vector<32x512xf32> to vector<32x512xbf16>
    %c0_5 = arith.constant 0 : index
    %c0_6 = arith.constant 0 : index
    %7 = vector.load %arg5[%c0_5, %c0_6] : memref<32x512xbf16, #tpu.memory_space<vmem>>, vector<32x512xbf16>
    tpu.vector_store %arg5[%c0_5, %c0_6], %6 {strides = array<i32>} : memref<32x512xbf16, #tpu.memory_space<vmem>>, vector<32x512xbf16>,
    return
  }
  func.func @transform_0(%arg0: i32, %arg1: i32) -> (i32, i32) {
    %c0_i32 = arith.constant 0 : i32
    %c0_i32_0 = arith.constant 0 : i32
    return %arg0, %c0_i32 : i32, i32
  }
  func.func @transform_1(%arg0: i32, %arg1: i32) -> (i32, i32) {
    %c0_i32 = arith.constant 0 : i32
    %c0_i32_0 = arith.constant 0 : i32
    return %c0_i32, %arg1 : i32, i32
  }
  func.func @transform_2(%arg0: i32, %arg1: i32) -> (i32, i32) {
    %c0_i32 = arith.constant 0 : i32
    %c0_i32_0 = arith.constant 0 : i32
    return %c0_i32, %arg1 : i32, i32
  }
  func.func @transform_3(%arg0: i32, %arg1: i32) -> (i32, i32) {
    %c0_i32 = arith.constant 0 : i32
    return %arg0, %arg1 : i32, i32
  }
}

module attributes {stable_mosaic.version = 11 : i64} {
  func.func @kernel(%arg0: i32, %arg1: memref<1x64x384xbf16, #tpu.memory_space<vmem>>, %arg2: memref<1x16x32x64xbf16, #tpu.memory_space<vmem>>, %arg3: memref<32x32xf32, #tpu.memory_space<vmem>>, %arg4: memref<32x1xf32, #tpu.memory_space<vmem>>, %arg5: memref<1x32x256xf32, #tpu.memory_space<vmem>>) attributes {dimension_semantics = [#tpu.dimension_semantics<parallel>], iteration_bounds = array<i64: 2>, scalar_prefetch = 0 : i64, scratch_operands = 0 : i64, tpu.core_type = #tpu.core_type<tc>, window_params = [{transform_indices = @transform_0, window_bounds = array<i64: 1, 64, 384>}, {transform_indices = @transform_1, window_bounds = array<i64: 1, 16, 32, 64>}, {pipeline_mode = #tpu.pipeline_mode<synchronous>, transform_indices = @transform_2, window_bounds = array<i64: 32, 32>}, {pipeline_mode = #tpu.pipeline_mode<synchronous>, transform_indices = @transform_3, window_bounds = array<i64: 32, 1>}, {transform_indices = @transform_4, window_bounds = array<i64: 1, 32, 256>}]} {
    %cst = arith.constant 0.000000e+00 : f32
    %0 = vector.broadcast %cst : f32 to vector<32x256xf32>
    %c0 = arith.constant 0 : index
    %c0_0 = arith.constant 0 : index
    %c0_1 = arith.constant 0 : index
    %c0_2 = arith.constant 0 : index
    %1 = vector.load %arg2[%c0, %c0_0, %c0_1, %c0_2] : memref<1x16x32x64xbf16, #tpu.memory_space<vmem>>, vector<1x1x32x64xbf16>
    %2 = vector.shape_cast %1 : vector<1x1x32x64xbf16> to vector<32x64xbf16>
    %c0_3 = arith.constant 0 : index
    %c0_4 = arith.constant 0 : index
    %c0_5 = arith.constant 0 : index
    %3 = vector.load %arg1[%c0_3, %c0_4, %c0_5] : memref<1x64x384xbf16, #tpu.memory_space<vmem>>, vector<1x64x256xbf16>
    %4 = vector.shape_cast %3 : vector<1x64x256xbf16> to vector<64x256xbf16>
    %cst_6 = arith.constant dense<0.000000e+00> : vector<32x256xf32>
    %5 = tpu.matmul %2, %4, %cst_6 {dimension_numbers = #tpu.dot_dimension_numbers<[1], [0], [0], [1], [0, 0, 1, 1], [], []>} : vector<32x64xbf16>, vector<64x256xbf16>, vector<32x256xf32> -> vector<32x256xf32>
    %6 = arith.addf %0, %5 : vector<32x256xf32>
    %c0_7 = arith.constant 0 : index
    %c1 = arith.constant 1 : index
    %c0_8 = arith.constant 0 : index
    %c0_9 = arith.constant 0 : index
    %7 = vector.load %arg2[%c0_7, %c1, %c0_8, %c0_9] : memref<1x16x32x64xbf16, #tpu.memory_space<vmem>>, vector<1x1x32x64xbf16>
    %8 = vector.shape_cast %7 : vector<1x1x32x64xbf16> to vector<32x64xbf16>
    %c0_10 = arith.constant 0 : index
    %c0_11 = arith.constant 0 : index
    %c1_12 = arith.constant 1 : index
    %9 = vector.load %arg1[%c0_10, %c0_11, %c1_12] : memref<1x64x384xbf16, #tpu.memory_space<vmem>>, vector<1x64x256xbf16>
    %10 = vector.shape_cast %9 : vector<1x64x256xbf16> to vector<64x256xbf16>
    %cst_13 = arith.constant dense<0.000000e+00> : vector<32x256xf32>
    %11 = tpu.matmul %8, %10, %cst_13 {dimension_numbers = #tpu.dot_dimension_numbers<[1], [0], [0], [1], [0, 0, 1, 1], [], []>} : vector<32x64xbf16>, vector<64x256xbf16>, vector<32x256xf32> -> vector<32x256xf32>
    %12 = arith.addf %6, %11 : vector<32x256xf32>
    %c0_14 = arith.constant 0 : index
    %c2 = arith.constant 2 : index
    %c0_15 = arith.constant 0 : index
    %c0_16 = arith.constant 0 : index
    %13 = vector.load %arg2[%c0_14, %c2, %c0_15, %c0_16] : memref<1x16x32x64xbf16, #tpu.memory_space<vmem>>, vector<1x1x32x64xbf16>
    %14 = vector.shape_cast %13 : vector<1x1x32x64xbf16> to vector<32x64xbf16>
    %c0_17 = arith.constant 0 : index
    %c0_18 = arith.constant 0 : index
    %c2_19 = arith.constant 2 : index
    %15 = vector.load %arg1[%c0_17, %c0_18, %c2_19] : memref<1x64x384xbf16, #tpu.memory_space<vmem>>, vector<1x64x256xbf16>
    %16 = vector.shape_cast %15 : vector<1x64x256xbf16> to vector<64x256xbf16>
    %cst_20 = arith.constant dense<0.000000e+00> : vector<32x256xf32>
    %17 = tpu.matmul %14, %16, %cst_20 {dimension_numbers = #tpu.dot_dimension_numbers<[1], [0], [0], [1], [0, 0, 1, 1], [], []>} : vector<32x64xbf16>, vector<64x256xbf16>, vector<32x256xf32> -> vector<32x256xf32>
    %18 = arith.addf %12, %17 : vector<32x256xf32>
    %c0_21 = arith.constant 0 : index
    %c3 = arith.constant 3 : index
    %c0_22 = arith.constant 0 : index
    %c0_23 = arith.constant 0 : index
    %19 = vector.load %arg2[%c0_21, %c3, %c0_22, %c0_23] : memref<1x16x32x64xbf16, #tpu.memory_space<vmem>>, vector<1x1x32x64xbf16>
    %20 = vector.shape_cast %19 : vector<1x1x32x64xbf16> to vector<32x64xbf16>
    %c0_24 = arith.constant 0 : index
    %c0_25 = arith.constant 0 : index
    %c3_26 = arith.constant 3 : index
    %21 = vector.load %arg1[%c0_24, %c0_25, %c3_26] : memref<1x64x384xbf16, #tpu.memory_space<vmem>>, vector<1x64x256xbf16>
    %22 = vector.shape_cast %21 : vector<1x64x256xbf16> to vector<64x256xbf16>
    %cst_27 = arith.constant dense<0.000000e+00> : vector<32x256xf32>
    %23 = tpu.matmul %20, %22, %cst_27 {dimension_numbers = #tpu.dot_dimension_numbers<[1], [0], [0], [1], [0, 0, 1, 1], [], []>} : vector<32x64xbf16>, vector<64x256xbf16>, vector<32x256xf32> -> vector<32x256xf32>
    %24 = arith.addf %18, %23 : vector<32x256xf32>
    %c0_28 = arith.constant 0 : index
    %c4 = arith.constant 4 : index
    %c0_29 = arith.constant 0 : index
    %c0_30 = arith.constant 0 : index
    %25 = vector.load %arg2[%c0_28, %c4, %c0_29, %c0_30] : memref<1x16x32x64xbf16, #tpu.memory_space<vmem>>, vector<1x1x32x64xbf16>
    %26 = vector.shape_cast %25 : vector<1x1x32x64xbf16> to vector<32x64xbf16>
    %c0_31 = arith.constant 0 : index
    %c0_32 = arith.constant 0 : index
    %c14 = arith.constant 14 : index
    %27 = vector.load %arg1[%c0_31, %c0_32, %c14] : memref<1x64x384xbf16, #tpu.memory_space<vmem>>, vector<1x64x256xbf16>
    %28 = vector.shape_cast %27 : vector<1x64x256xbf16> to vector<64x256xbf16>
    %cst_33 = arith.constant dense<0.000000e+00> : vector<32x256xf32>
    %29 = tpu.matmul %26, %28, %cst_33 {dimension_numbers = #tpu.dot_dimension_numbers<[1], [0], [0], [1], [0, 0, 1, 1], [], []>} : vector<32x64xbf16>, vector<64x256xbf16>, vector<32x256xf32> -> vector<32x256xf32>
    %30 = arith.addf %24, %29 : vector<32x256xf32>
    %c0_34 = arith.constant 0 : index
    %c5 = arith.constant 5 : index
    %c0_35 = arith.constant 0 : index
    %c0_36 = arith.constant 0 : index
    %31 = vector.load %arg2[%c0_34, %c5, %c0_35, %c0_36] : memref<1x16x32x64xbf16, #tpu.memory_space<vmem>>, vector<1x1x32x64xbf16>
    %32 = vector.shape_cast %31 : vector<1x1x32x64xbf16> to vector<32x64xbf16>
    %c0_37 = arith.constant 0 : index
    %c0_38 = arith.constant 0 : index
    %c15 = arith.constant 15 : index
    %33 = vector.load %arg1[%c0_37, %c0_38, %c15] : memref<1x64x384xbf16, #tpu.memory_space<vmem>>, vector<1x64x256xbf16>
    %34 = vector.shape_cast %33 : vector<1x64x256xbf16> to vector<64x256xbf16>
    %cst_39 = arith.constant dense<0.000000e+00> : vector<32x256xf32>
    %35 = tpu.matmul %32, %34, %cst_39 {dimension_numbers = #tpu.dot_dimension_numbers<[1], [0], [0], [1], [0, 0, 1, 1], [], []>} : vector<32x64xbf16>, vector<64x256xbf16>, vector<32x256xf32> -> vector<32x256xf32>
    %36 = arith.addf %30, %35 : vector<32x256xf32>
    %c0_40 = arith.constant 0 : index
    %c6 = arith.constant 6 : index
    %c0_41 = arith.constant 0 : index
    %c0_42 = arith.constant 0 : index
    %37 = vector.load %arg2[%c0_40, %c6, %c0_41, %c0_42] : memref<1x16x32x64xbf16, #tpu.memory_space<vmem>>, vector<1x1x32x64xbf16>
    %38 = vector.shape_cast %37 : vector<1x1x32x64xbf16> to vector<32x64xbf16>
    %c0_43 = arith.constant 0 : index
    %c0_44 = arith.constant 0 : index
    %c16 = arith.constant 16 : index
    %39 = vector.load %arg1[%c0_43, %c0_44, %c16] : memref<1x64x384xbf16, #tpu.memory_space<vmem>>, vector<1x64x256xbf16>
    %40 = vector.shape_cast %39 : vector<1x64x256xbf16> to vector<64x256xbf16>
    %cst_45 = arith.constant dense<0.000000e+00> : vector<32x256xf32>
    %41 = tpu.matmul %38, %40, %cst_45 {dimension_numbers = #tpu.dot_dimension_numbers<[1], [0], [0], [1], [0, 0, 1, 1], [], []>} : vector<32x64xbf16>, vector<64x256xbf16>, vector<32x256xf32> -> vector<32x256xf32>
    %42 = arith.addf %36, %41 : vector<32x256xf32>
    %c0_46 = arith.constant 0 : index
    %c7 = arith.constant 7 : index
    %c0_47 = arith.constant 0 : index
    %c0_48 = arith.constant 0 : index
    %43 = vector.load %arg2[%c0_46, %c7, %c0_47, %c0_48] : memref<1x16x32x64xbf16, #tpu.memory_space<vmem>>, vector<1x1x32x64xbf16>
    %44 = vector.shape_cast %43 : vector<1x1x32x64xbf16> to vector<32x64xbf16>
    %c0_49 = arith.constant 0 : index
    %c0_50 = arith.constant 0 : index
    %c17 = arith.constant 17 : index
    %45 = vector.load %arg1[%c0_49, %c0_50, %c17] : memref<1x64x384xbf16, #tpu.memory_space<vmem>>, vector<1x64x256xbf16>
    %46 = vector.shape_cast %45 : vector<1x64x256xbf16> to vector<64x256xbf16>
    %cst_51 = arith.constant dense<0.000000e+00> : vector<32x256xf32>
    %47 = tpu.matmul %44, %46, %cst_51 {dimension_numbers = #tpu.dot_dimension_numbers<[1], [0], [0], [1], [0, 0, 1, 1], [], []>} : vector<32x64xbf16>, vector<64x256xbf16>, vector<32x256xf32> -> vector<32x256xf32>
    %48 = arith.addf %42, %47 : vector<32x256xf32>
    %c0_52 = arith.constant 0 : index
    %c8 = arith.constant 8 : index
    %c0_53 = arith.constant 0 : index
    %c0_54 = arith.constant 0 : index
    %49 = vector.load %arg2[%c0_52, %c8, %c0_53, %c0_54] : memref<1x16x32x64xbf16, #tpu.memory_space<vmem>>, vector<1x1x32x64xbf16>
    %50 = vector.shape_cast %49 : vector<1x1x32x64xbf16> to vector<32x64xbf16>
    %c0_55 = arith.constant 0 : index
    %c0_56 = arith.constant 0 : index
    %c28 = arith.constant 28 : index
    %51 = vector.load %arg1[%c0_55, %c0_56, %c28] : memref<1x64x384xbf16, #tpu.memory_space<vmem>>, vector<1x64x256xbf16>
    %52 = vector.shape_cast %51 : vector<1x64x256xbf16> to vector<64x256xbf16>
    %cst_57 = arith.constant dense<0.000000e+00> : vector<32x256xf32>
    %53 = tpu.matmul %50, %52, %cst_57 {dimension_numbers = #tpu.dot_dimension_numbers<[1], [0], [0], [1], [0, 0, 1, 1], [], []>} : vector<32x64xbf16>, vector<64x256xbf16>, vector<32x256xf32> -> vector<32x256xf32>
    %54 = arith.addf %48, %53 : vector<32x256xf32>
    %c0_58 = arith.constant 0 : index
    %c9 = arith.constant 9 : index
    %c0_59 = arith.constant 0 : index
    %c0_60 = arith.constant 0 : index
    %55 = vector.load %arg2[%c0_58, %c9, %c0_59, %c0_60] : memref<1x16x32x64xbf16, #tpu.memory_space<vmem>>, vector<1x1x32x64xbf16>
    %56 = vector.shape_cast %55 : vector<1x1x32x64xbf16> to vector<32x64xbf16>
    %c0_61 = arith.constant 0 : index
    %c0_62 = arith.constant 0 : index
    %c29 = arith.constant 29 : index
    %57 = vector.load %arg1[%c0_61, %c0_62, %c29] : memref<1x64x384xbf16, #tpu.memory_space<vmem>>, vector<1x64x256xbf16>
    %58 = vector.shape_cast %57 : vector<1x64x256xbf16> to vector<64x256xbf16>
    %cst_63 = arith.constant dense<0.000000e+00> : vector<32x256xf32>
    %59 = tpu.matmul %56, %58, %cst_63 {dimension_numbers = #tpu.dot_dimension_numbers<[1], [0], [0], [1], [0, 0, 1, 1], [], []>} : vector<32x64xbf16>, vector<64x256xbf16>, vector<32x256xf32> -> vector<32x256xf32>
    %60 = arith.addf %54, %59 : vector<32x256xf32>
    %c0_64 = arith.constant 0 : index
    %c10 = arith.constant 10 : index
    %c0_65 = arith.constant 0 : index
    %c0_66 = arith.constant 0 : index
    %61 = vector.load %arg2[%c0_64, %c10, %c0_65, %c0_66] : memref<1x16x32x64xbf16, #tpu.memory_space<vmem>>, vector<1x1x32x64xbf16>
    %62 = vector.shape_cast %61 : vector<1x1x32x64xbf16> to vector<32x64xbf16>
    %c0_67 = arith.constant 0 : index
    %c0_68 = arith.constant 0 : index
    %c30 = arith.constant 30 : index
    %63 = vector.load %arg1[%c0_67, %c0_68, %c30] : memref<1x64x384xbf16, #tpu.memory_space<vmem>>, vector<1x64x256xbf16>
    %64 = vector.shape_cast %63 : vector<1x64x256xbf16> to vector<64x256xbf16>
    %cst_69 = arith.constant dense<0.000000e+00> : vector<32x256xf32>
    %65 = tpu.matmul %62, %64, %cst_69 {dimension_numbers = #tpu.dot_dimension_numbers<[1], [0], [0], [1], [0, 0, 1, 1], [], []>} : vector<32x64xbf16>, vector<64x256xbf16>, vector<32x256xf32> -> vector<32x256xf32>
    %66 = arith.addf %60, %65 : vector<32x256xf32>
    %c0_70 = arith.constant 0 : index
    %c11 = arith.constant 11 : index
    %c0_71 = arith.constant 0 : index
    %c0_72 = arith.constant 0 : index
    %67 = vector.load %arg2[%c0_70, %c11, %c0_71, %c0_72] : memref<1x16x32x64xbf16, #tpu.memory_space<vmem>>, vector<1x1x32x64xbf16>
    %68 = vector.shape_cast %67 : vector<1x1x32x64xbf16> to vector<32x64xbf16>
    %c0_73 = arith.constant 0 : index
    %c0_74 = arith.constant 0 : index
    %c31 = arith.constant 31 : index
    %69 = vector.load %arg1[%c0_73, %c0_74, %c31] : memref<1x64x384xbf16, #tpu.memory_space<vmem>>, vector<1x64x256xbf16>
    %70 = vector.shape_cast %69 : vector<1x64x256xbf16> to vector<64x256xbf16>
    %cst_75 = arith.constant dense<0.000000e+00> : vector<32x256xf32>
    %71 = tpu.matmul %68, %70, %cst_75 {dimension_numbers = #tpu.dot_dimension_numbers<[1], [0], [0], [1], [0, 0, 1, 1], [], []>} : vector<32x64xbf16>, vector<64x256xbf16>, vector<32x256xf32> -> vector<32x256xf32>
    %72 = arith.addf %66, %71 : vector<32x256xf32>
    %c0_76 = arith.constant 0 : index
    %c12 = arith.constant 12 : index
    %c0_77 = arith.constant 0 : index
    %c0_78 = arith.constant 0 : index
    %73 = vector.load %arg2[%c0_76, %c12, %c0_77, %c0_78] : memref<1x16x32x64xbf16, #tpu.memory_space<vmem>>, vector<1x1x32x64xbf16>
    %74 = vector.shape_cast %73 : vector<1x1x32x64xbf16> to vector<32x64xbf16>
    %c0_79 = arith.constant 0 : index
    %c0_80 = arith.constant 0 : index
    %c42 = arith.constant 42 : index
    %75 = vector.load %arg1[%c0_79, %c0_80, %c42] : memref<1x64x384xbf16, #tpu.memory_space<vmem>>, vector<1x64x256xbf16>
    %76 = vector.shape_cast %75 : vector<1x64x256xbf16> to vector<64x256xbf16>
    %cst_81 = arith.constant dense<0.000000e+00> : vector<32x256xf32>
    %77 = tpu.matmul %74, %76, %cst_81 {dimension_numbers = #tpu.dot_dimension_numbers<[1], [0], [0], [1], [0, 0, 1, 1], [], []>} : vector<32x64xbf16>, vector<64x256xbf16>, vector<32x256xf32> -> vector<32x256xf32>
    %78 = arith.addf %72, %77 : vector<32x256xf32>
    %c0_82 = arith.constant 0 : index
    %c13 = arith.constant 13 : index
    %c0_83 = arith.constant 0 : index
    %c0_84 = arith.constant 0 : index
    %79 = vector.load %arg2[%c0_82, %c13, %c0_83, %c0_84] : memref<1x16x32x64xbf16, #tpu.memory_space<vmem>>, vector<1x1x32x64xbf16>
    %80 = vector.shape_cast %79 : vector<1x1x32x64xbf16> to vector<32x64xbf16>
    %c0_85 = arith.constant 0 : index
    %c0_86 = arith.constant 0 : index
    %c43 = arith.constant 43 : index
    %81 = vector.load %arg1[%c0_85, %c0_86, %c43] : memref<1x64x384xbf16, #tpu.memory_space<vmem>>, vector<1x64x256xbf16>
    %82 = vector.shape_cast %81 : vector<1x64x256xbf16> to vector<64x256xbf16>
    %cst_87 = arith.constant dense<0.000000e+00> : vector<32x256xf32>
    %83 = tpu.matmul %80, %82, %cst_87 {dimension_numbers = #tpu.dot_dimension_numbers<[1], [0], [0], [1], [0, 0, 1, 1], [], []>} : vector<32x64xbf16>, vector<64x256xbf16>, vector<32x256xf32> -> vector<32x256xf32>
    %84 = arith.addf %78, %83 : vector<32x256xf32>
    %c0_88 = arith.constant 0 : index
    %c14_89 = arith.constant 14 : index
    %c0_90 = arith.constant 0 : index
    %c0_91 = arith.constant 0 : index
    %85 = vector.load %arg2[%c0_88, %c14_89, %c0_90, %c0_91] : memref<1x16x32x64xbf16, #tpu.memory_space<vmem>>, vector<1x1x32x64xbf16>
    %86 = vector.shape_cast %85 : vector<1x1x32x64xbf16> to vector<32x64xbf16>
    %c0_92 = arith.constant 0 : index
    %c0_93 = arith.constant 0 : index
    %c44 = arith.constant 44 : index
    %87 = vector.load %arg1[%c0_92, %c0_93, %c44] : memref<1x64x384xbf16, #tpu.memory_space<vmem>>, vector<1x64x256xbf16>
    %88 = vector.shape_cast %87 : vector<1x64x256xbf16> to vector<64x256xbf16>
    %cst_94 = arith.constant dense<0.000000e+00> : vector<32x256xf32>
    %89 = tpu.matmul %86, %88, %cst_94 {dimension_numbers = #tpu.dot_dimension_numbers<[1], [0], [0], [1], [0, 0, 1, 1], [], []>} : vector<32x64xbf16>, vector<64x256xbf16>, vector<32x256xf32> -> vector<32x256xf32>
    %90 = arith.addf %84, %89 : vector<32x256xf32>
    %c0_95 = arith.constant 0 : index
    %c15_96 = arith.constant 15 : index
    %c0_97 = arith.constant 0 : index
    %c0_98 = arith.constant 0 : index
    %91 = vector.load %arg2[%c0_95, %c15_96, %c0_97, %c0_98] : memref<1x16x32x64xbf16, #tpu.memory_space<vmem>>, vector<1x1x32x64xbf16>
    %92 = vector.shape_cast %91 : vector<1x1x32x64xbf16> to vector<32x64xbf16>
    %c0_99 = arith.constant 0 : index
    %c0_100 = arith.constant 0 : index
    %c45 = arith.constant 45 : index
    %93 = vector.load %arg1[%c0_99, %c0_100, %c45] : memref<1x64x384xbf16, #tpu.memory_space<vmem>>, vector<1x64x256xbf16>
    %94 = vector.shape_cast %93 : vector<1x64x256xbf16> to vector<64x256xbf16>
    %cst_101 = arith.constant dense<0.000000e+00> : vector<32x256xf32>
    %95 = tpu.matmul %92, %94, %cst_101 {dimension_numbers = #tpu.dot_dimension_numbers<[1], [0], [0], [1], [0, 0, 1, 1], [], []>} : vector<32x64xbf16>, vector<64x256xbf16>, vector<32x256xf32> -> vector<32x256xf32>
    %96 = arith.addf %90, %95 : vector<32x256xf32>
    %c0_102 = arith.constant 0 : index
    %c0_103 = arith.constant 0 : index
    %97 = vector.load %arg3[%c0_102, %c0_103] : memref<32x32xf32, #tpu.memory_space<vmem>>, vector<32x32xf32>
    %cst_104 = arith.constant dense<0.000000e+00> : vector<32x256xf32>
    %98 = tpu.matmul %97, %96, %cst_104 {dimension_numbers = #tpu.dot_dimension_numbers<[1], [0], [0], [1], [0, 0, 1, 1], [], []>} : vector<32x32xf32>, vector<32x256xf32>, vector<32x256xf32> -> vector<32x256xf32>
    %c0_105 = arith.constant 0 : index
    %c0_106 = arith.constant 0 : index
    %99 = vector.load %arg4[%c0_105, %c0_106] : memref<32x1xf32, #tpu.memory_space<vmem>>, vector<32x1xf32>
    %100 = vector.broadcast %99 : vector<32x1xf32> to vector<32x256xf32>
    %101 = arith.addf %98, %100 : vector<32x256xf32>
    %c0_107 = arith.constant 0 : index
    %c0_108 = arith.constant 0 : index
    %c0_109 = arith.constant 0 : index
    %102 = vector.load %arg5[%c0_107, %c0_108, %c0_109] : memref<1x32x256xf32, #tpu.memory_space<vmem>>, vector<1x32x256xf32>
    %103 = vector.shape_cast %102 : vector<1x32x256xf32> to vector<32x256xf32>
    %104 = vector.shape_cast %101 : vector<32x256xf32> to vector<1x32x256xf32>
    tpu.vector_store %arg5[%c0_107, %c0_108, %c0_109], %104 {strides = array<i32>} : memref<1x32x256xf32, #tpu.memory_space<vmem>>, vector<1x32x256xf32>,
    return
  }
  func.func @transform_0(%arg0: i32) -> (i32, i32, i32) {
    %c0_i32 = arith.constant 0 : i32
    %c0_i32_0 = arith.constant 0 : i32
    %c0_i32_1 = arith.constant 0 : i32
    return %arg0, %c0_i32, %c0_i32_0 : i32, i32, i32
  }
  func.func @transform_1(%arg0: i32) -> (i32, i32, i32, i32) {
    %c0_i32 = arith.constant 0 : i32
    %c0_i32_0 = arith.constant 0 : i32
    %c0_i32_1 = arith.constant 0 : i32
    %c0_i32_2 = arith.constant 0 : i32
    return %arg0, %c0_i32, %c0_i32_0, %c0_i32_1 : i32, i32, i32, i32
  }
  func.func @transform_2(%arg0: i32) -> (i32, i32) {
    %c0_i32 = arith.constant 0 : i32
    %c0_i32_0 = arith.constant 0 : i32
    %c0_i32_1 = arith.constant 0 : i32
    return %c0_i32, %c0_i32_0 : i32, i32
  }
  func.func @transform_3(%arg0: i32) -> (i32, i32) {
    %c0_i32 = arith.constant 0 : i32
    %c0_i32_0 = arith.constant 0 : i32
    %c0_i32_1 = arith.constant 0 : i32
    return %c0_i32, %c0_i32_0 : i32, i32
  }
  func.func @transform_4(%arg0: i32) -> (i32, i32, i32) {
    %c0_i32 = arith.constant 0 : i32
    %c0_i32_0 = arith.constant 0 : i32
    %c0_i32_1 = arith.constant 0 : i32
    return %arg0, %c0_i32, %c0_i32_0 : i32, i32, i32
  }
}

</mosaic_0001>

<bundles_post_ra>
// kernel: rpn_head_forward.3
= control target key start
LH: loop header
LB: loop body
LE: loop exit
PB: predicated region body
PF: predicated region fallthrough
CT: control target
= control target key end

     0   :  { %s1231_s12 = smov 0   ;;  %s1233_s13 = smov 0   ;;  %s1375_s0 = inlined_call_operand.vmem [shape: bf16[512,72], index: 0, kind: input, shape index: {}]   ;;  %s1376_s1 = inlined_call_operand.vmem [shape: bf16[72,128], index: 1, kind: input, shape index: {}]   ;;  %s1377_s2 = inlined_call_operand.vmem [shape: f32[1,128], index: 2, kind: input, shape index: {}]   ;;  %s1378_s3 = inlined_call_operand.vmem [shape: bf16[512,128], index: 3, kind: output, shape index: {}]  }
   0x1   :  { %s1235_s14 = smov 0  }
   0x2 LB: > { %s25_s15 = sadd.s32 1, %s1205_s13  ;;  %p863_p0 = scmp.ge.s32.totalorder %s1209_s14, 1  ;;  %s1209_s14 = sphi %s1235_s14, %s13_s14   ;;  %s1205_s13 = sphi %s1233_s13, %s1380_s13   ;;  %s1201_s12 = sphi %s1231_s12, %s1379_s12  }
   0x3   : > { %p27_p1 = scmp.ge.s32.totalorder %s25_s15, 2  ;;  %p169_p2 = scmp.lt.s32.totalorder %s1209_s14, 3 }
   0x5   : > { %s1382_s15 = smov (%p27_p1, %s25_s15), 0  ;;  %p170_p3 = pnand %p863_p0, %p169_p2 }
   0x6   : > { %s864_s20 = sshll.u32 (!%p170_p3), %s1201_s12, 5 }
   0x7   : > { %173 = sbr.rel (%p170_p3) target bundleno = 261 (0x105), region = 32  ;;  %p204_p4 = scmp.lt.s32.totalorder (!%p170_p3), %s864_s20, 63 }
   0xc   : > { %v1166_v0 = vld [vmem:[%s1376_s1 + $0x20] ss:$0 sps:$4 sm:$0xff]   ;;  %vm430_vm0 = vcmask 1043456   ;;  %v1167_v1 = vld [vmem:[%s1376_s1 + $0x18] sm:$0xff]   ;;  %v1168_v3 = vld [vmem:[%s1376_s1 + $0x10] sm:$0xff]   ;;  %s1384_s20 = smov (!%p204_p4, %s864_s20), 63 }
   0xd   : > { %1140 = vmatprep.subr.msk.bf16.mxu0 %vm430_vm0, %v1166_v0  ;;  %1141 = vmatprep.subr.msk.bf16.mxu1 %vm430_vm0, %v1166_v0  ;;  %v432_v2 = vsel %vm430_vm0, %v1166_v0, 0  ;;  %v1169_v4 = vld [vmem:[%s1376_s1 + $0x8] sm:$0xff]   ;;  %s865_s25 = sshll.u32 %s1384_s20, 2  ;;  %vm381_vm1 = vcmask 588800   ;;  %v1170_v7 = vld [vmem:[%s1376_s1] sm:$0xff]  }
   0xe   : > { %1089 = vmatpush3.bf16.msra.mxu0 %v432_v2  ;;  %1135 = vmatpush3.bf16.msra.mxu1 %v432_v2  ;;  %s1269_s28 = scalar_lea.vmem %s1375_s0, %s865_s25  ;;  %v1309_v24 = vld [vmem:[%s1377_s2] ss:$0 sm:$0xff]  ;;  %s1322_s8 = scalar_lea.vmem %s1378_s3, %s865_s25 }
   0xf   : > { %1090 = vmatprep.subr.bf16.mxu0 %v1167_v1  ;;  %1131 = vmatprep.subr.bf16.mxu1 %v1167_v1  ;;  %v1171_v5 = vld [vmem:[%s1269_s28] sm:$0xff]   ;;  %v1173_v8 = vld [vmem:[%s1269_s28 + $0x8] sm:$0xff]   ;;  %v1175_v10 = vld [vmem:[%s1269_s28 + $0x10] sm:$0xff]  }
  0x10   : > { %v1172_v6 = vld [vmem:[%s1269_s28 + $0x40] sm:$0xff]   ;;  %1098 = vmatprep.mubr.msk.bf16.mxu0 %vm381_vm1, %v1171_v5  ;;  %v1174_v9 = vld [vmem:[%s1269_s28 + $0x48] sm:$0xff]   ;;  %v1176_v11 = vld [vmem:[%s1269_s28 + $0x50] sm:$0xff]  }
  0x11   : > { %1114 = vmatprep.mubr.msk.bf16.mxu1 %vm381_vm1, %v1172_v6  ;;  %v1177_v12 = vld [vmem:[%s1269_s28 + $0x18] sm:$0xff]   ;;  %v1179_v14 = vld [vmem:[%s1269_s28 + $0x20] sm:$0xff]   ;;  %v1181_v16 = vld [vmem:[%s1269_s28 + $0x28] sm:$0xff]  }
  0x12   : > { %1091 = vmatpush3.bf16.msra.mxu0 %v1167_v1  ;;  %1136 = vmatpush3.bf16.msra.mxu1 %v1167_v1  ;;  %v1178_v13 = vld [vmem:[%s1269_s28 + $0x58] sm:$0xff]   ;;  %v1180_v15 = vld [vmem:[%s1269_s28 + $0x60] sm:$0xff]   ;;  %v1182_v17 = vld [vmem:[%s1269_s28 + $0x68] sm:$0xff]  }
  0x13   : > { %1092 = vmatprep.subr.bf16.mxu0 %v1168_v3  ;;  %1132 = vmatprep.subr.bf16.mxu1 %v1168_v3  ;;  %v1183_v18 = vld [vmem:[%s1269_s28 + $0x30] sm:$0xff]   ;;  %v1185_v20 = vld [vmem:[%s1269_s28 + $0x38] sm:$0xff]  }
  0x14   : > { %v1184_v19 = vld [vmem:[%s1269_s28 + $0x70] sm:$0xff]   ;;  %v1186_v21 = vld [vmem:[%s1269_s28 + $0x78] sm:$0xff]  }
  0x16   : > { %1093 = vmatpush3.bf16.msra.mxu0 %v1168_v3  ;;  %1137 = vmatpush3.bf16.msra.mxu1 %v1168_v3 }
  0x17   : > { %1094 = vmatprep.subr.bf16.mxu0 %v1169_v4  ;;  %1133 = vmatprep.subr.bf16.mxu1 %v1169_v4 }
  0x1a   : > { %1095 = vmatpush3.bf16.msra.mxu0 %v1169_v4  ;;  %1138 = vmatpush3.bf16.msra.mxu1 %v1169_v4 }
  0x1b   : > { %1096 = vmatprep.subr.bf16.mxu0 %v1170_v7  ;;  %1134 = vmatprep.subr.bf16.mxu1 %v1170_v7 }
  0x1e   : > { %1097 = vmatpush3.bf16.msra.mxu0 %v1170_v7  ;;  %1139 = vmatpush3.bf16.msra.mxu1 %v1170_v7 }
  0x21   : > { %1099 = vmatmul.mubr.msk.bf16.vlgmr.msra.gmra.mxu0 %vm381_vm1, %v1173_v8  ;;  %1115 = vmatmul.mubr.msk.bf16.vlgmr.msra.gmra.mxu1 %vm381_vm1, %v1174_v9 }
  0x22   : > { %1102 = vmatprep.mubr.msk.bf16.mxu0 %vm381_vm1, %v1175_v10  ;;  %1118 = vmatprep.mubr.msk.bf16.mxu1 %vm381_vm1, %v1176_v11 }
  0x29   : > { %1103 = vmatmul.mubr.msk.bf16.gmra.mxu0 %vm381_vm1, %v1177_v12  ;;  %1119 = vmatmul.mubr.msk.bf16.gmra.mxu1 %vm381_vm1, %v1178_v13 }
  0x2a   : > { %1106 = vmatprep.mubr.msk.bf16.mxu0 %vm381_vm1, %v1179_v14  ;;  %1122 = vmatprep.mubr.msk.bf16.mxu1 %vm381_vm1, %v1180_v15 }
  0x31   : > { %1107 = vmatmul.mubr.msk.bf16.gmra.mxu0 %vm381_vm1, %v1181_v16  ;;  %1123 = vmatmul.mubr.msk.bf16.gmra.mxu1 %vm381_vm1, %v1182_v17 }
  0x32   : > { %1110 = vmatprep.mubr.msk.bf16.mxu0 %vm381_vm1, %v1183_v18  ;;  %1126 = vmatprep.mubr.msk.bf16.mxu1 %vm381_vm1, %v1184_v19 }
  0x39   : > { %1111 = vmatmul.mubr.msk.bf16.gmra.mxu0 %vm381_vm1, %v1185_v20  ;;  %1127 = vmatmul.mubr.msk.bf16.gmra.mxu1 %vm381_vm1, %v1186_v21 }
  0xe1   : > { %v1100_v22 = vpop.f32.mrf.mxu0  ;;  %v1116_v23 = vpop.f32.mrf.mxu1 }
  0xe2   : > { %v477_v29 = vadd.f32 %v1100_v22, %v1309_v24  ;;  %v541_v30 = vadd.f32 %v1116_v23, %v1309_v24 }
  0xe3   : > { %v468_v25 = vpop.f32.mrf.mxu0  ;;  %v532_v26 = vpop.f32.mrf.mxu1 }
  0xe4   : > { %v469_v33 = vadd.f32 %v1309_v24, %v468_v25  ;;  %v533_v34 = vadd.f32 %v1309_v24, %v532_v26 }
  0xe5   : > { %v1101_v27 = vpop.f32.mrf.mxu0  ;;  %v1117_v28 = vpop.f32.mrf.mxu1 }
  0xe6   : > { %v480_v31 = vadd.f32 %v1101_v27, %v1309_v24  ;;  %v544_v32 = vadd.f32 %v1117_v28, %v1309_v24 }
  0xe7   : > { %v471_v35 = vpop.f32.mrf.mxu0  ;;  %v535_v36 = vpop.f32.mrf.mxu1 }
  0xe8   : > { %v980_v37 = vpack.c.bf16 %v480_v31, %v477_v29  ;;  %v1020_v38 = vpack.c.bf16 %v544_v32, %v541_v30  ;;  %v472_v39 = vadd.f32 %v1309_v24, %v471_v35  ;;  %v536_v40 = vadd.f32 %v1309_v24, %v535_v36 }
  0xe9   : > { %v1104_v41 = vpop.f32.mrf.mxu0  ;;  %v1120_v42 = vpop.f32.mrf.mxu1 }
  0xea   : > { %1052 = vst [vmem:[%s1322_s8 + $0x8] sm:$0xff] %v980_v37   ;;  %1060 = vst [vmem:[%s1322_s8 + $0x48] sm:$0xff] %v1020_v38   ;;  %v975_v43 = vpack.c.bf16 %v472_v39, %v469_v33  ;;  %v1015_v44 = vpack.c.bf16 %v536_v40, %v533_v34  ;;  %v493_v49 = vadd.f32 %v1104_v41, %v1309_v24 }
  0xeb   : > { %v484_v45 = vpop.f32.mrf.mxu0  ;;  %v548_v46 = vpop.f32.mrf.mxu1  ;;  %v557_v50 = vadd.f32 %v1120_v42, %v1309_v24 }
  0xec   : > { %976 = vst [vmem:[%s1322_s8] sm:$0xff] %v975_v43   ;;  %1059 = vst [vmem:[%s1322_s8 + $0x40] sm:$0xff] %v1015_v44   ;;  %v485_v53 = vadd.f32 %v1309_v24, %v484_v45  ;;  %v549_v54 = vadd.f32 %v1309_v24, %v548_v46 }
  0xed   : > { %v1105_v47 = vpop.f32.mrf.mxu0  ;;  %v1121_v48 = vpop.f32.mrf.mxu1 }
  0xee   : > { %v496_v51 = vadd.f32 %v1105_v47, %v1309_v24  ;;  %v560_v52 = vadd.f32 %v1121_v48, %v1309_v24 }
  0xef   : > { %v487_v55 = vpop.f32.mrf.mxu0  ;;  %v551_v56 = vpop.f32.mrf.mxu1 }
  0xf0   : > { %v990_v57 = vpack.c.bf16 %v496_v51, %v493_v49  ;;  %v1030_v58 = vpack.c.bf16 %v560_v52, %v557_v50  ;;  %v488_v59 = vadd.f32 %v1309_v24, %v487_v55  ;;  %v552_v60 = vadd.f32 %v1309_v24, %v551_v56 }
  0xf1   : > { %v1108_v61 = vpop.f32.mrf.mxu0  ;;  %v1124_v62 = vpop.f32.mrf.mxu1 }
  0xf2   : > { %1054 = vst [vmem:[%s1322_s8 + $0x18] sm:$0xff] %v990_v57   ;;  %1062 = vst [vmem:[%s1322_s8 + $0x58] sm:$0xff] %v1030_v58   ;;  %v985_v63 = vpack.c.bf16 %v488_v59, %v485_v53  ;;  %v1025_v0 = vpack.c.bf16 %v552_v60, %v549_v54  ;;  %v509_v5 = vadd.f32 %v1108_v61, %v1309_v24 }
  0xf3   : > { %v500_v1 = vpop.f32.mrf.mxu0  ;;  %v564_v2 = vpop.f32.mrf.mxu1  ;;  %v573_v6 = vadd.f32 %v1124_v62, %v1309_v24 }
  0xf4   : > { %1053 = vst [vmem:[%s1322_s8 + $0x10] sm:$0xff] %v985_v63   ;;  %1061 = vst [vmem:[%s1322_s8 + $0x50] sm:$0xff] %v1025_v0   ;;  %v501_v9 = vadd.f32 %v1309_v24, %v500_v1  ;;  %v565_v10 = vadd.f32 %v1309_v24, %v564_v2 }
  0xf5   : > { %v1109_v3 = vpop.f32.mrf.mxu0  ;;  %v1125_v4 = vpop.f32.mrf.mxu1 }
  0xf6   : > { %v512_v7 = vadd.f32 %v1109_v3, %v1309_v24  ;;  %v576_v8 = vadd.f32 %v1125_v4, %v1309_v24 }
  0xf7   : > { %v503_v11 = vpop.f32.mrf.mxu0  ;;  %v567_v12 = vpop.f32.mrf.mxu1 }
  0xf8   : > { %v1000_v13 = vpack.c.bf16 %v512_v7, %v509_v5  ;;  %v1040_v14 = vpack.c.bf16 %v576_v8, %v573_v6  ;;  %v504_v15 = vadd.f32 %v1309_v24, %v503_v11  ;;  %v568_v16 = vadd.f32 %v1309_v24, %v567_v12 }
  0xf9   : > { %v1112_v17 = vpop.f32.mrf.mxu0  ;;  %v1128_v18 = vpop.f32.mrf.mxu1 }
  0xfa   : > { %1056 = vst [vmem:[%s1322_s8 + $0x28] sm:$0xff] %v1000_v13   ;;  %1064 = vst [vmem:[%s1322_s8 + $0x68] sm:$0xff] %v1040_v14   ;;  %v995_v19 = vpack.c.bf16 %v504_v15, %v501_v9  ;;  %v1035_v20 = vpack.c.bf16 %v568_v16, %v565_v10  ;;  %v525_v26 = vadd.f32 %v1112_v17, %v1309_v24 }
  0xfb   : > { %v516_v21 = vpop.f32.mrf.mxu0  ;;  %v580_v22 = vpop.f32.mrf.mxu1  ;;  %v589_v27 = vadd.f32 %v1128_v18, %v1309_v24 }
  0xfc   : > { %1055 = vst [vmem:[%s1322_s8 + $0x20] sm:$0xff] %v995_v19   ;;  %1063 = vst [vmem:[%s1322_s8 + $0x60] sm:$0xff] %v1035_v20   ;;  %v517_v30 = vadd.f32 %v1309_v24, %v516_v21  ;;  %v581_v31 = vadd.f32 %v1309_v24, %v580_v22 }
  0xfd   : > { %v1113_v23 = vpop.f32.mrf.mxu0  ;;  %v1129_v25 = vpop.f32.mrf.mxu1 }
  0xfe   : > { %v528_v28 = vadd.f32 %v1113_v23, %v1309_v24  ;;  %v592_v29 = vadd.f32 %v1129_v25, %v1309_v24 }
  0xff   : > { %v519_v32 = vpop.f32.mrf.mxu0  ;;  %v583_v33 = vpop.f32.mrf.mxu1 }
 0x100   : > { %v1010_v34 = vpack.c.bf16 %v528_v28, %v525_v26  ;;  %v1050_v35 = vpack.c.bf16 %v592_v29, %v589_v27  ;;  %v520_v36 = vadd.f32 %v1309_v24, %v519_v32  ;;  %v584_v37 = vadd.f32 %v1309_v24, %v583_v33 }
 0x102   : > { %1058 = vst [vmem:[%s1322_s8 + $0x38] sm:$0xff] %v1010_v34   ;;  %1066 = vst [vmem:[%s1322_s8 + $0x78] sm:$0xff] %v1050_v35   ;;  %v1005_v38 = vpack.c.bf16 %v520_v36, %v517_v30  ;;  %v1045_v39 = vpack.c.bf16 %v584_v37, %v581_v31 }
 0x104   : > { %1057 = vst [vmem:[%s1322_s8 + $0x30] sm:$0xff] %v1005_v38   ;;  %1065 = vst [vmem:[%s1322_s8 + $0x70] sm:$0xff] %v1045_v39  }
 0x105 PF: > { %s13_s14 = sadd.s32 1, %s1209_s14   ;;  %s1379_s12 = smov %s1205_s13 }
 0x106   : > { %p10_p5 = scmp.ge.s32.totalorder %s13_s14, 4   ;;  %s1380_s13 = smov %s1382_s15 }
 0x108   :  { %12 = sbr.rel (!%p10_p5) target bundleno = 2 (0x2), region = 68 }

// kernel: rpn_head_forward.4
= control target key start
LH: loop header
LB: loop body
LE: loop exit
PB: predicated region body
PF: predicated region fallthrough
CT: control target
= control target key end

     0   :  { %s935_s12 = smov 0   ;;  %s937_s13 = smov 0   ;;  %s1079_s0 = inlined_call_operand.vmem [shape: bf16[32,72], index: 0, kind: input, shape index: {}]   ;;  %s1080_s1 = inlined_call_operand.vmem [shape: bf16[72,1024], index: 1, kind: input, shape index: {}]   ;;  %s1081_s2 = inlined_call_operand.vmem [shape: f32[1,1024], index: 2, kind: input, shape index: {}]   ;;  %s1082_s3 = inlined_call_operand.vmem [shape: bf16[32,1024], index: 3, kind: output, shape index: {}]  }
   0x1   :  { %s939_s14 = smov 0   ;;  %s941_s15 = smov 0  }
   0x2   :  { %s943_s16 = smov 0  }
   0x3 LB: > { %s22_s17 = sadd.s32 1, %s908_s15  ;;  %s740_s18 = sadd.s32 4294967295, %s912_s16   ;;  %s912_s16 = sphi %s943_s16, %s13_s16   ;;  %s908_s15 = sphi %s941_s15, %s1087_s15   ;;  %s904_s14 = sphi %s939_s14, %s1086_s14   ;;  %s900_s13 = sphi %s937_s13, %s1085_s13   ;;  %s896_s12 = sphi %s935_s12, %s1084_s12  }
   0x4   : > { %p23_p0 = scmp.ge.s32.totalorder %s22_s17, 2  ;;  %p65_p1 = scmp.ne.s32.totalorder %s900_s13, %s896_s12 }
   0x5   : > { %p66_p2 = scmp.eq.s32.totalorder %s912_s16, 0  ;;  %p123_p4 = scmp.eq.s32.totalorder %s740_s18, 1 }
   0x6   : > { %s1089_s17 = smov (%p23_p0, %s22_s17), 0  ;;  %s58_s20 = sadd.s32 1, %s900_s13 }
   0x7   : > { %p67_p3 = por %p66_p2, %p65_p1  ;;  %s55_s19 = ssub.s32 %s908_s15, %s1089_s17 }
   0x8   : > { %p56_p5 = scmp.eq.s32.totalorder %s55_s19, 0  ;;  %p970_p6 = por %p123_p4, %p65_p1 }
   0x9   : > { %p744_p7 = scmp.ge.s32.totalorder %s912_s16, 2 }
   0xa   : > { %s975_s22 = scalar_select %p56_p5, %s900_s13, %s58_s20  }
   0xb   : > { %154 = sbr.rel (%p744_p7) target bundleno = 29 (0x1d), region = 20 }
  0x10   : > { %157 = sbr.rel (!%p67_p3) target bundleno = 29 (0x1d), region = 24  ;;  %s159_s23 = sand.u32 (%p67_p3), 1, %s900_s13  }
  0x11   : > { %s791_s24 = sshll.u32 (%p67_p3), %s908_s15, 4  ;;  %s801_s25 = smul.u32 (%p67_p3), 144, %s159_s23 }
  0x12   : > { %s983_s28 = scalar_lea.vmem (%p67_p3), %s1080_s1, %s791_s24 }
  0x13   : > { %v177_v0 = vld [vmem:[%s983_s28] sm:$0xff] (%p67_p3)  ;;  %v179_v1 = vld [vmem:[%s983_s28 + $0x8] sm:$0xff] (%p67_p3)  ;;  %s161_s29 = scalar_lea.vmem (%p67_p3), [#allocation2], %s801_s25 }
  0x14   : > { %v181_v2 = vld [vmem:[%s983_s28 + $0x20] sm:$0xff] (%p67_p3)  ;;  %v183_v3 = vld [vmem:[%s983_s28 + $0x28] sm:$0xff] (%p67_p3)  ;;  %178 = vst [vmem:[%s161_s29] sm:$0xff] (%p67_p3), %v177_v0  ;;  %180 = vst [vmem:[%s161_s29 + $0x8] sm:$0xff] (%p67_p3), %v179_v1 }
  0x15   : > { %v185_v4 = vld [vmem:[%s983_s28 + $0x40] sm:$0xff]  ;;  %v187_v5 = vld [vmem:[%s983_s28 + $0x48] sm:$0xff]  ;;  %182 = vst [vmem:[%s161_s29 + $0x10] sm:$0xff] %v181_v2  ;;  %184 = vst [vmem:[%s161_s29 + $0x18] sm:$0xff] %v183_v3 }
  0x16   : > { %186 = vst [vmem:[%s161_s29 + $0x20] sm:$0xff] %v185_v4  ;;  %188 = vst [vmem:[%s161_s29 + $0x28] sm:$0xff] %v187_v5  ;;  %v189_v6 = vld [vmem:[%s983_s28 + $0x60] sm:$0xff]  ;;  %v191_v7 = vld [vmem:[%s983_s28 + $0x68] sm:$0xff] }
  0x17   : > { %v193_v8 = vld [vmem:[%s983_s28 + $0x80] sm:$0xff]  ;;  %190 = vst [vmem:[%s161_s29 + $0x30] sm:$0xff] %v189_v6  ;;  %192 = vst [vmem:[%s161_s29 + $0x38] sm:$0xff] %v191_v7  ;;  %v195_v9 = vld [vmem:[%s983_s28 + $0x88] sm:$0xff] }
  0x18   : > { %194 = vst [vmem:[%s161_s29 + $0x40] sm:$0xff] %v193_v8  ;;  %v197_v10 = vld [vmem:[%s983_s28 + $0xa0] sm:$0xff]  ;;  %v199_v11 = vld [vmem:[%s983_s28 + $0xa8] sm:$0xff]  ;;  %196 = vst [vmem:[%s161_s29 + $0x48] sm:$0xff] %v195_v9 }
  0x19   : > { %198 = vst [vmem:[%s161_s29 + $0x50] sm:$0xff] %v197_v10  ;;  %200 = vst [vmem:[%s161_s29 + $0x58] sm:$0xff] %v199_v11  ;;  %v201_v12 = vld [vmem:[%s983_s28 + $0xc0] sm:$0xff]  ;;  %v203_v13 = vld [vmem:[%s983_s28 + $0xc8] sm:$0xff] }
  0x1a   : > { %v205_v14 = vld [vmem:[%s983_s28 + $0xe0] sm:$0xff]  ;;  %202 = vst [vmem:[%s161_s29 + $0x60] sm:$0xff] %v201_v12  ;;  %204 = vst [vmem:[%s161_s29 + $0x68] sm:$0xff] %v203_v13  ;;  %v207_v15 = vld [vmem:[%s983_s28 + $0xe8] sm:$0xff] }
  0x1b   : > { %206 = vst [vmem:[%s161_s29 + $0x70] sm:$0xff] %v205_v14  ;;  %v209_v16 = vld [vmem:[%s983_s28 + $0x100] sm:$0xff]  ;;  %v211_v17 = vld [vmem:[%s983_s28 + $0x108] sm:$0xff]  ;;  %208 = vst [vmem:[%s161_s29 + $0x78] sm:$0xff] %v207_v15 }
  0x1c   : > { %210 = vst [vmem:[%s161_s29 + $0x80] sm:$0xff] %v209_v16  ;;  %212 = vst [vmem:[%s161_s29 + $0x88] sm:$0xff] %v211_v17 }
  0x1d PF: > { %p747_p8 = scmp.ge.s32.totalorder %s912_s16, 1  ;;  %p225_p9 = scmp.lt.s32.totalorder %s912_s16, 3 }
  0x1f   : > { %p226_p10 = pnand %p747_p8, %p225_p9 }
  0x20   : > { %s232_s30 = sand.u32 (!%p226_p10), 1, %s896_s12   ;;  %s749_s10 = sshll.u32 (!%p226_p10), %s904_s14, 2 }
  0x21   : > { %229 = sbr.rel (%p226_p10) target bundleno = 282 (0x11a), region = 51  ;;  %p271_p11 = scmp.lt.s32.totalorder (!%p226_p10), %s749_s10, 7 }
  0x22   : > { %s802_s4 = smul.u32 (!%p226_p10), 144, %s232_s30  ;;  %s748_s20 = sshll.u32 (!%p226_p10), %s232_s30, 6 }
  0x23   : > { %s1040_s23 = scalar_lea.vmem (!%p226_p10), [#allocation3], %s748_s20 }
  0x24   : > { %s1008_s5 = scalar_lea.vmem (!%p226_p10), [#allocation2], %s802_s4 }
  0x26   : > { %v914_v18 = vmov 0   ;;  %v298_v19 = vld [vmem:[%s1008_s5 + $0x80] sm:$0xff]  ;;  %vm429_vm0 = vcmask 1043456   ;;  %v299_v20 = vld [vmem:[%s1008_s5 + $0x88] sm:$0xff]  ;;  %vm422_vm1 = vcmask 588800   ;;  %v302_v45 = vlaneseq  ;;  %s1091_s10 = smov (!%p271_p11, %s749_s10), 7 }
  0x27   : > { %474 = vmatprep.mubr.bf16.mxu0 %v914_v18  ;;  %527 = vmatprep.mubr.bf16.mxu1 %v914_v18  ;;  %v769_v21 = vcombine.high %v298_v19, %v298_v19  ;;  %v771_v22 = vcombine.high %v299_v20, %v299_v20  ;;  %v768_v23 = vcombine.low %v298_v19, %v298_v19  ;;  %v848_v25 = vld [vmem:[%s1008_s5 + $0x64] ss:$16 sps:$4 sm:$0xff]   ;;  %v850_v26 = vld [vmem:[%s1008_s5 + $0x6c] ss:$16 sps:$4 sm:$0xff]   ;;  %v852_v29 = vld [vmem:[%s1008_s5 + $0x60] ss:$16 sps:$4 sm:$0xff]   ;;  %s273_s19 = scalar_lea.vmem %s1081_s2, %s1091_s10 }
  0x28   : > { %v770_v24 = vcombine.low %v299_v20, %v299_v20  ;;  %v853_v30 = vld [vmem:[%s1008_s5 + $0x68] ss:$16 sps:$4 sm:$0xff]   ;;  %v854_v31 = vld [vmem:[%s1008_s5 + $0x44] ss:$16 sps:$4 sm:$0xff]   ;;  %v856_v32 = vld [vmem:[%s1008_s5 + $0x4c] ss:$16 sps:$4 sm:$0xff]  }
  0x29   : > { %772 = vmatprep.subr.msk.bf16.mxu0 %vm429_vm0, %v769_v21  ;;  %775 = vmatprep.subr.msk.bf16.mxu1 %vm429_vm0, %v771_v22  ;;  %v431_v27 = vsel %vm429_vm0, %v768_v23, 0  ;;  %v858_v33 = vld [vmem:[%s1008_s5 + $0x40] ss:$16 sps:$4 sm:$0xff]   ;;  %v859_v34 = vld [vmem:[%s1008_s5 + $0x48] ss:$16 sps:$4 sm:$0xff]   ;;  %v303_v46 = vshrl.u32 %v302_v45, 7 }
  0x2a   : > { %v437_v28 = vsel %vm429_vm0, %v770_v24, 0  ;;  %449 = vmatpush1.bf16.msra.mxu0 %v431_v27  ;;  %v860_v35 = vld [vmem:[%s1008_s5 + $0x24] ss:$16 sps:$4 sm:$0xff]   ;;  %v862_v36 = vld [vmem:[%s1008_s5 + $0x2c] ss:$16 sps:$4 sm:$0xff]   ;;  %s800_s12 = sshll.u32 (%p970_p6), %s904_s14, 4 }
  0x2b   : > { %502 = vmatpush1.bf16.msra.mxu1 %v437_v28  ;;  %450 = vmatprep.subr.bf16.mxu0 %v848_v25  ;;  %v864_v37 = vld [vmem:[%s1008_s5 + $0x20] ss:$16 sps:$4 sm:$0xff]   ;;  %v865_v38 = vld [vmem:[%s1008_s5 + $0x28] ss:$16 sps:$4 sm:$0xff]   ;;  %v866_v39 = vld [vmem:[%s1008_s5 + $0x4] ss:$16 sps:$4 sm:$0xff]   ;;  %s616_s26 = scalar_lea.vmem (%p970_p6), %s1082_s3, %s800_s12 }
  0x2c   : > { %503 = vmatprep.subr.bf16.mxu1 %v850_v26  ;;  %v868_v40 = vld [vmem:[%s1008_s5 + $0xc] ss:$16 sps:$4 sm:$0xff]   ;;  %v870_v41 = vld [vmem:[%s1008_s5] ss:$16 sps:$4 sm:$0xff]   ;;  %v871_v42 = vld [vmem:[%s1008_s5 + $0x8] ss:$16 sps:$4 sm:$0xff]  }
  0x2d   : > { %v872_v43 = vld [vmem:[%s1079_s0] sm:$0xff]   ;;  %v873_v44 = vld [vmem:[%s1079_s0 + $0x8] sm:$0xff]   ;;  %v304_v47 = vsub.s32 0, %v303_v46  ;;  %v312_v48 = vsub.s32 2, %v303_v46  ;;  %v308_v49 = vsub.s32 1, %v303_v46  ;;  %v316_v50 = vsub.s32 3, %v303_v46 }
  0x2e   : > { %451 = vmatpush1.bf16.msra.mxu0 %v852_v29  ;;  %v300_v51 = vld [vmem:[%s273_s19] sm:$0xf] }
  0x2f   : > { %504 = vmatpush1.bf16.msra.mxu1 %v853_v30  ;;  %452 = vmatprep.subr.bf16.mxu0 %v854_v31  ;;  %v305_v52 = vrot.slane %v300_v51, %v304_v47  ;;  %v313_v53 = vrot.slane %v300_v51, %v312_v48  ;;  %v309_v54 = vrot.slane %v300_v51, %v308_v49 }
  0x30   : > { %505 = vmatprep.subr.bf16.mxu1 %v856_v32  ;;  %v317_v55 = vrot.slane %v300_v51, %v316_v50 }
  0x32   : > { %453 = vmatpush1.bf16.msra.mxu0 %v858_v33 }
  0x33   : > { %506 = vmatpush1.bf16.msra.mxu1 %v859_v34  ;;  %454 = vmatprep.subr.bf16.mxu0 %v860_v35 }
  0x34   : > { %507 = vmatprep.subr.bf16.mxu1 %v862_v36 }
  0x36   : > { %455 = vmatpush1.bf16.msra.mxu0 %v864_v37 }
  0x37   : > { %508 = vmatpush1.bf16.msra.mxu1 %v865_v38  ;;  %456 = vmatprep.subr.bf16.mxu0 %v866_v39 }
  0x38   : > { %509 = vmatprep.subr.bf16.mxu1 %v868_v40 }
  0x3a   : > { %457 = vmatpush1.bf16.msra.mxu0 %v870_v41 }
  0x3b   : > { %510 = vmatpush1.bf16.msra.mxu1 %v871_v42 }
  0x3d   : > { %773 = vmatmul.mubr.msk.bf16.vlgmr.msra.gmra.mxu0 %vm422_vm1, %v872_v43 }
  0x3e   : > { %776 = vmatmul.mubr.msk.bf16.vlgmr.msra.gmra.mxu1 %vm422_vm1, %v872_v43  ;;  %484 = vmatprep.mubr.bf16.mxu0 %v914_v18 }
  0x3f   : > { %537 = vmatprep.mubr.bf16.mxu1 %v914_v18 }
  0x45   : > { %774 = vmatmul.mubr.msk.bf16.gmra.mxu0 %vm422_vm1, %v873_v44 }
  0x46   : > { %777 = vmatmul.mubr.msk.bf16.gmra.mxu1 %vm422_vm1, %v873_v44 }
  0xfd   : > { %v476_v56 = vpop.f32.mrf.mxu0 }
  0xfe   : > { %v529_v57 = vpop.f32.mrf.mxu1  ;;  %v477_v60 = vadd.f32 %v476_v56, %v305_v52 }
  0xff   : > { %v478_v58 = vpop.f32.mrf.mxu0  ;;  %v530_v61 = vadd.f32 %v529_v57, %v313_v53 }
 0x100   : > { %v531_v59 = vpop.f32.mrf.mxu1  ;;  %v479_v62 = vadd.f32 %v478_v58, %v309_v54 }
 0x101   : > { %v532_v63 = vadd.f32 %v531_v59, %v317_v55  ;;  %v480_v0 = vpop.f32.mrf.mxu0 }
 0x102   : > { %v533_v1 = vpop.f32.mrf.mxu1  ;;  %v792_v2 = vpack.c.bf16 %v479_v62, %v477_v60  ;;  %v481_v6 = vadd.f32 %v480_v0, %v305_v52 }
 0x103   : > { %v793_v3 = vpack.c.bf16 %v532_v63, %v530_v61  ;;  %v482_v4 = vpop.f32.mrf.mxu0  ;;  %v534_v7 = vadd.f32 %v533_v1, %v313_v53 }
 0x104   : > { %v535_v5 = vpop.f32.mrf.mxu1  ;;  %596 = vst [vmem:[%s1040_s23] sm:$0xff] %v792_v2  ;;  %v483_v8 = vadd.f32 %v482_v4, %v309_v54 }
 0x105   : > { %597 = vst [vmem:[%s1040_s23 + $0x8] sm:$0xff] %v793_v3  ;;  %v536_v9 = vadd.f32 %v535_v5, %v317_v55  ;;  %v486_v10 = vpop.f32.mrf.mxu0 }
 0x106   : > { %v539_v11 = vpop.f32.mrf.mxu1  ;;  %v794_v12 = vpack.c.bf16 %v483_v8, %v481_v6  ;;  %v487_v16 = vadd.f32 %v486_v10, %v305_v52 }
 0x107   : > { %v795_v13 = vpack.c.bf16 %v536_v9, %v534_v7  ;;  %v488_v14 = vpop.f32.mrf.mxu0  ;;  %v540_v17 = vadd.f32 %v539_v11, %v313_v53 }
 0x108   : > { %v541_v15 = vpop.f32.mrf.mxu1  ;;  %598 = vst [vmem:[%s1040_s23 + $0x10] sm:$0xff] %v794_v12  ;;  %v489_v18 = vadd.f32 %v488_v14, %v309_v54 }
 0x109   : > { %599 = vst [vmem:[%s1040_s23 + $0x18] sm:$0xff] %v795_v13  ;;  %v542_v19 = vadd.f32 %v541_v15, %v317_v55  ;;  %v490_v20 = vpop.f32.mrf.mxu0 }
 0x10a   : > { %v543_v21 = vpop.f32.mrf.mxu1  ;;  %v796_v22 = vpack.c.bf16 %v489_v18, %v487_v16  ;;  %v491_v26 = vadd.f32 %v490_v20, %v305_v52 }
 0x10b   : > { %v797_v23 = vpack.c.bf16 %v542_v19, %v540_v17  ;;  %v492_v24 = vpop.f32.mrf.mxu0  ;;  %v544_v27 = vadd.f32 %v543_v21, %v313_v53  ;;  %v629_v32 = vld [vmem:[%s1040_s23] sm:$0xff] (%p970_p6) }
 0x10c   : > { %v545_v25 = vpop.f32.mrf.mxu1  ;;  %600 = vst [vmem:[%s1040_s23 + $0x20] sm:$0xff] %v796_v22  ;;  %v493_v28 = vadd.f32 %v492_v24, %v309_v54  ;;  %v631_v33 = vld [vmem:[%s1040_s23 + $0x8] sm:$0xff] (%p970_p6)  ;;  %630 = vst [vmem:[%s616_s26] sm:$0xff] (%p970_p6), %v629_v32 }
 0x10d   : > { %601 = vst [vmem:[%s1040_s23 + $0x28] sm:$0xff] %v797_v23  ;;  %v546_v29 = vadd.f32 %v545_v25, %v317_v55  ;;  %610 = sbr.rel (!%p970_p6) target bundleno = 282 (0x11a), region = 59  ;;  %632 = vst [vmem:[%s616_s26 + $0x8] sm:$0xff] (%p970_p6), %v631_v33 }
 0x10e   : > { %v798_v30 = vpack.c.bf16 %v493_v28, %v491_v26 }
 0x10f   : > { %v799_v31 = vpack.c.bf16 %v546_v29, %v544_v27  ;;  %v633_v34 = vld [vmem:[%s1040_s23 + $0x10] sm:$0xff] (%p970_p6) }
 0x110   : > { %602 = vst [vmem:[%s1040_s23 + $0x30] sm:$0xff] %v798_v30  ;;  %v635_v35 = vld [vmem:[%s1040_s23 + $0x18] sm:$0xff] (%p970_p6)  ;;  %634 = vst [vmem:[%s616_s26 + $0x20] sm:$0xff] (%p970_p6), %v633_v34 }
 0x111   : > { %603 = vst [vmem:[%s1040_s23 + $0x38] sm:$0xff] %v799_v31  ;;  %636 = vst [vmem:[%s616_s26 + $0x28] sm:$0xff] (%p970_p6), %v635_v35 }
 0x113   : > { %v637_v36 = vld [vmem:[%s1040_s23 + $0x20] sm:$0xff] }
 0x114   : > { %v639_v37 = vld [vmem:[%s1040_s23 + $0x28] sm:$0xff]  ;;  %638 = vst [vmem:[%s616_s26 + $0x40] sm:$0xff] %v637_v36 }
 0x115   : > { %640 = vst [vmem:[%s616_s26 + $0x48] sm:$0xff] %v639_v37 }
 0x117   : > { %v641_v38 = vld [vmem:[%s1040_s23 + $0x30] sm:$0xff] }
 0x118   : > { %v643_v39 = vld [vmem:[%s1040_s23 + $0x38] sm:$0xff]  ;;  %642 = vst [vmem:[%s616_s26 + $0x60] sm:$0xff] %v641_v38 }
 0x119   : > { %644 = vst [vmem:[%s616_s26 + $0x68] sm:$0xff] %v643_v39 }
 0x11a PF: > { %s13_s16 = sadd.s32 1, %s912_s16   ;;  %s1084_s12 = smov %s900_s13 }
 0x11b   : > { %p10_p12 = scmp.ge.s32.totalorder %s13_s16, 4   ;;  %s1085_s13 = smov %s975_s22 }
 0x11c   : > { %s1086_s14 = smov %s908_s15  ;;  %s1087_s15 = smov %s1089_s17 }
 0x11d   :  { %12 = sbr.rel (!%p10_p12) target bundleno = 3 (0x3), region = 119 }

// kernel: rpn_head_forward.5
= control target key start
LH: loop header
LB: loop body
LE: loop exit
PB: predicated region body
PF: predicated region fallthrough
CT: control target
= control target key end

     0   :  { %s2759_s15 = smov 0   ;;  %s3595_s0 = inlined_call_operand.vmem [shape: bf16[2,64,384], index: 0, kind: input, shape index: {}]   ;;  %s3596_s1 = inlined_call_operand.vmem [shape: bf16[2,16,32,64], index: 1, kind: input, shape index: {}]   ;;  %s3597_s2 = inlined_call_operand.vmem [shape: f32[32,32], index: 2, kind: input, shape index: {}]   ;;  %s3598_s3 = inlined_call_operand.vmem [shape: f32[32,1], index: 3, kind: input, shape index: {}]   ;;  %s3599_s4 = inlined_call_operand.vmem [shape: f32[2,32,256], index: 4, kind: output, shape index: {}]  }
   0x1 LB: > { %s2451_s16 = sadd.s32 4294967295, %s2715_s15   ;;  %p2455_p0 = scmp.ge.s32.totalorder %s2715_s15, 1  ;;  %s2715_s15 = sphi %s2759_s15, %s14_s15  }
   0x2   : > { %p172_p1 = scmp.lt.s32.totalorder %s2715_s15, 3 }
   0x4   : > { %p173_p2 = pnand %p2455_p0, %p172_p1 }
   0x6   : > { %176 = sbr.rel (%p173_p2) target bundleno = 913 (0x391), region = 36 }
   0xb   : > { %p203_p3 = scmp.lt.s32.totalorder %s2451_s16, 1  ;;  %s2717_s25 = smov 127   ;;  %v2718_v12 = vmov 0   ;;  %vm355_vm0 = vcmask 523264   ;;  %vm338_vm1 = vcmask 1039360   ;;  %vm563_vm2 = vcmask 1031168  }
   0xc   : > { %394 = vmatprep.mubr.bf16.mxu0 %v2718_v12  ;;  %503 = vmatprep.mubr.bf16.mxu1 %v2718_v12  ;;  %s2719_s26 = smov 126   ;;  %s2720_s27 = smov 125   ;;  %vm686_vm3 = vcmask 1022976   ;;  %vm809_vm4 = vcmask 932864   ;;  %vm932_vm5 = vcmask 924672   ;;  %vm1055_vm6 = vcmask 916480  }
   0xd   : > { %s3624_s16 = smov (!%p203_p3, %s2451_s16), 1  ;;  %2648 = vset.pattern.permute.xlu1 %v2718_v12  ;;  %2647 = vset.pattern.permute.xlu0 %v2718_v12  ;;  %s2721_s28 = smov 114   ;;  %vm1178_vm7 = vcmask 908288   ;;  %vm1301_vm8 = vcmask 818176   ;;  %vm1424_vm9 = vcmask 809984   ;;  %vm1547_vm10 = vcmask 801792  }
   0xe   : > { %s2621_s17 = smul.u32 96, %s3624_s16  ;;  %s2611_s18 = sshll.u32 %s3624_s16, 8  ;;  %vm1670_vm11 = vcmask 793600   ;;  %vm1793_vm12 = vcmask 703488   ;;  %vm1916_vm13 = vcmask 695296   ;;  %vm2039_vm14 = vcmask 687104  }
   0xf   : > { %s2774_s21 = scalar_lea.vmem %s3596_s1, %s2611_s18  ;;  %s2722_s29 = smov 113   ;;  %vm2162_vm15 = vcmask 678912  }
  0x10   : > { %s2779_s24 = scalar_lea.vmem %s3595_s0, %s2621_s17  ;;  %v2666_v13 = vld [vmem:[%s2774_s21] sm:$0xff]   ;;  %v2668_v14 = vld [vmem:[%s2774_s21 + $0x8] sm:$0xff]   ;;  %s2723_s30 = smov 112   ;;  %v2665_v35 = vld [vmem:[%s2774_s21 + $0x10] sm:$0xff]  }
  0x11   : > { %v2782_v0 = vld [vmem:[%s2779_s24 + $0x4c] ss:$12 sps:$4 sm:$0xff]   ;;  %v2785_v1 = vld [vmem:[%s2779_s24 + $0x48] ss:$12 sps:$4 sm:$0xff]   ;;  %v2790_v2 = vld [vmem:[%s2779_s24 + $0x50] ss:$12 sps:$4 sm:$0xff]  }
  0x12   : > { %334 = vrot.lane.b32.xlu0 %v2782_v0, %s2717_s25  ;;  %479 = vmatprep.subr.bf16.mxu1 %v2782_v0  ;;  %v2796_v3 = vld [vmem:[%s2779_s24 + $0x34] ss:$12 sps:$4 sm:$0xff]   ;;  %v2800_v4 = vld [vmem:[%s2779_s24 + $0x30] ss:$12 sps:$4 sm:$0xff]   ;;  %v2806_v5 = vld [vmem:[%s2779_s24 + $0x38] ss:$12 sps:$4 sm:$0xff]  }
  0x13   : > { %332 = vrot.lane.b32.xlu1 %v2785_v1, %s2717_s25  ;;  %480 = vmatpush1.bf16.msra.mxu1 %v2785_v1  ;;  %v2809_v6 = vld [vmem:[%s2779_s24 + $0x1c] ss:$12 sps:$4 sm:$0xff]   ;;  %v2815_v7 = vld [vmem:[%s2779_s24 + $0x18] ss:$12 sps:$4 sm:$0xff]   ;;  %v2819_v8 = vld [vmem:[%s2779_s24 + $0x20] ss:$12 sps:$4 sm:$0xff]  }
  0x14   : > { %481 = vmatprep.subr.bf16.mxu1 %v2796_v3  ;;  %v2822_v9 = vld [vmem:[%s2779_s24 + $0x4] ss:$12 sps:$4 sm:$0xff]   ;;  %v2831_v10 = vld [vmem:[%s2779_s24] ss:$12 sps:$4 sm:$0xff]   ;;  %v2841_v11 = vld [vmem:[%s2779_s24 + $0x8] ss:$12 sps:$4 sm:$0xff]  }
  0x15   : > { %s2724_s5 = smov 111   ;;  %v2667_v43 = vld [vmem:[%s2774_s21 + $0x18] sm:$0xff]   ;;  %s2725_s6 = smov 100  }
  0x16   : > { %336 = vrot.lane.b32.xlu0 %v2790_v2, %s2717_s25  ;;  %s2726_s7 = smov 99   ;;  %s2727_s8 = smov 98  }
  0x17   : > { %328 = vrot.lane.b32.xlu1 %v2796_v3, %s2717_s25  ;;  %482 = vmatpush1.bf16.msra.mxu1 %v2800_v4  ;;  %s2728_s9 = smov 97   ;;  %s2729_s10 = smov 86  }
  0x18   : > { %483 = vmatprep.subr.bf16.mxu1 %v2809_v6  ;;  %s2730_s11 = smov 85   ;;  %s2731_s12 = smov 84  }
  0x19   : > { %s2732_s13 = smov 83  }
  0x1a   : > { %330 = vrot.lane.b32.xlu0 %v2806_v5, %s2717_s25 }
  0x1b   : > { %326 = vrot.lane.b32.xlu1 %v2800_v4, %s2717_s25  ;;  %484 = vmatpush1.bf16.msra.mxu1 %v2815_v7 }
  0x1c   : > { %485 = vmatprep.subr.bf16.mxu1 %v2822_v9 }
  0x1e   : > { %322 = vrot.lane.b32.xlu0 %v2809_v6, %s2717_s25 }
  0x1f   : > { %324 = vrot.lane.b32.xlu1 %v2819_v8, %s2717_s25  ;;  %486 = vmatpush1.bf16.msra.mxu1 %v2831_v10 }
  0x22   : > { %320 = vrot.lane.b32.xlu0 %v2815_v7, %s2717_s25  ;;  %2491 = vmatmul.mubr.msk.bf16.vlgmr.msra.gmra.mxu1 %vm355_vm0, %v2666_v13 }
  0x23   : > { %316 = vrot.lane.b32.xlu1 %v2822_v9, %s2717_s25  ;;  %513 = vmatprep.mubr.bf16.mxu1 %v2718_v12 }
  0x26   : > { %318 = vrot.lane.b32.xlu0 %v2841_v11, %s2717_s25 }
  0x27   : > { %314 = vrot.lane.b32.xlu1 %v2831_v10, %s2717_s25 }
  0x2a   : > { %559 = vrot.lane.b32.xlu0 %v2782_v0, %s2719_s26  ;;  %2492 = vmatmul.mubr.msk.bf16.gmra.mxu1 %vm355_vm0, %v2668_v14 }
  0x2b   : > { %561 = vrot.lane.b32.xlu1 %v2790_v2, %s2719_s26  ;;  %741 = vmatprep.mubr.bf16.mxu1 %v2718_v12 }
  0x2e   : > { %557 = vrot.lane.b32.xlu0 %v2785_v1, %s2719_s26 }
  0x2f   : > { %682 = vrot.lane.b32.xlu1 %v2782_v0, %s2720_s27 }
  0x32   : > { %684 = vrot.lane.b32.xlu0 %v2790_v2, %s2720_s27 }
  0x33   : > { %680 = vrot.lane.b32.xlu1 %v2785_v1, %s2720_s27 }
  0x36   : > { %553 = vrot.lane.b32.xlu0 %v2796_v3, %s2719_s26 }
  0x37   : > { %555 = vrot.lane.b32.xlu1 %v2806_v5, %s2719_s26 }
  0x3a   : > { %551 = vrot.lane.b32.xlu0 %v2800_v4, %s2719_s26 }
  0x3b   : > { %676 = vrot.lane.b32.xlu1 %v2796_v3, %s2720_s27 }
  0x3e   : > { %678 = vrot.lane.b32.xlu0 %v2806_v5, %s2720_s27 }
  0x3f   : > { %674 = vrot.lane.b32.xlu1 %v2800_v4, %s2720_s27 }
  0x42   : > { %547 = vrot.lane.b32.xlu0 %v2809_v6, %s2719_s26 }
  0x43   : > { %549 = vrot.lane.b32.xlu1 %v2819_v8, %s2719_s26 }
  0x46   : > { %545 = vrot.lane.b32.xlu0 %v2815_v7, %s2719_s26 }
  0x47   : > { %670 = vrot.lane.b32.xlu1 %v2809_v6, %s2720_s27 }
  0x4a   : > { %672 = vrot.lane.b32.xlu0 %v2819_v8, %s2720_s27 }
  0x4b   : > { %668 = vrot.lane.b32.xlu1 %v2815_v7, %s2720_s27 }
  0x4e   : > { %541 = vrot.lane.b32.xlu0 %v2822_v9, %s2719_s26 }
  0x4f   : > { %543 = vrot.lane.b32.xlu1 %v2841_v11, %s2719_s26 }
  0x52   : > { %539 = vrot.lane.b32.xlu0 %v2831_v10, %s2719_s26 }
  0x53   : > { %664 = vrot.lane.b32.xlu1 %v2822_v9, %s2720_s27 }
  0x56   : > { %666 = vrot.lane.b32.xlu0 %v2841_v11, %s2720_s27 }
  0x57   : > { %662 = vrot.lane.b32.xlu1 %v2831_v10, %s2720_s27 }
  0x5a   : > { %805 = vrot.lane.b32.xlu0 %v2782_v0, %s2721_s28 }
  0x5b   : > { %807 = vrot.lane.b32.xlu1 %v2790_v2, %s2721_s28 }
  0x5e   : > { %803 = vrot.lane.b32.xlu0 %v2785_v1, %s2721_s28 }
  0x5f   : > { %928 = vrot.lane.b32.xlu1 %v2782_v0, %s2722_s29 }
  0x62   : > { %930 = vrot.lane.b32.xlu0 %v2790_v2, %s2722_s29 }
  0x63   : > { %926 = vrot.lane.b32.xlu1 %v2785_v1, %s2722_s29 }
  0x66   : > { %799 = vrot.lane.b32.xlu0 %v2796_v3, %s2721_s28 }
  0x67   : > { %801 = vrot.lane.b32.xlu1 %v2806_v5, %s2721_s28 }
  0x6a   : > { %797 = vrot.lane.b32.xlu0 %v2800_v4, %s2721_s28 }
  0x6b   : > { %922 = vrot.lane.b32.xlu1 %v2796_v3, %s2722_s29 }
  0x6e   : > { %924 = vrot.lane.b32.xlu0 %v2806_v5, %s2722_s29 }
  0x6f   : > { %920 = vrot.lane.b32.xlu1 %v2800_v4, %s2722_s29 }
  0x72   : > { %793 = vrot.lane.b32.xlu0 %v2809_v6, %s2721_s28 }
  0x73   : > { %795 = vrot.lane.b32.xlu1 %v2819_v8, %s2721_s28 }
  0x76   : > { %791 = vrot.lane.b32.xlu0 %v2815_v7, %s2721_s28 }
  0x77   : > { %916 = vrot.lane.b32.xlu1 %v2809_v6, %s2722_s29 }
  0x7a   : > { %918 = vrot.lane.b32.xlu0 %v2819_v8, %s2722_s29 }
  0x7b   : > { %914 = vrot.lane.b32.xlu1 %v2815_v7, %s2722_s29 }
  0x7e   : > { %787 = vrot.lane.b32.xlu0 %v2822_v9, %s2721_s28 }
  0x7f   : > { %789 = vrot.lane.b32.xlu1 %v2841_v11, %s2721_s28 }
  0x82   : > { %785 = vrot.lane.b32.xlu0 %v2831_v10, %s2721_s28 }
  0x83   : > { %910 = vrot.lane.b32.xlu1 %v2822_v9, %s2722_s29 }
  0x84   : > { %v335_v15 = vpop.permute.xlu0 %334 }
  0x85   : > { %v333_v16 = vpop.permute.xlu1 %332 }
  0x86   : > { %912 = vrot.lane.b32.xlu0 %v2841_v11, %s2722_s29  ;;  %v345_v20 = vsel %vm338_vm1, %v333_v16, %v335_v15 }
  0x87   : > { %908 = vrot.lane.b32.xlu1 %v2831_v10, %s2722_s29 }
  0x88   : > { %v337_v17 = vpop.permute.xlu0 %336 }
  0x89   : > { %v329_v18 = vpop.permute.xlu1 %328  ;;  %v346_v19 = vsel %vm338_vm1, %v335_v15, %v337_v17 }
  0x8a   : > { %370 = vmatprep.subr.bf16.mxu0 %v346_v19  ;;  %1051 = vrot.lane.b32.xlu0 %v2782_v0, %s2723_s30 }
  0x8b   : > { %1053 = vrot.lane.b32.xlu1 %v2790_v2, %s2723_s30  ;;  %371 = vmatpush1.bf16.msra.mxu0 %v345_v20 }
  0x8c   : > { %v331_v21 = vpop.permute.xlu0 %330 }
  0x8d   : > { %v327_v22 = vpop.permute.xlu1 %326  ;;  %v344_v23 = vsel %vm338_vm1, %v329_v18, %v331_v21 }
  0x8e   : > { %372 = vmatprep.subr.bf16.mxu0 %v344_v23  ;;  %1049 = vrot.lane.b32.xlu0 %v2785_v1, %s2723_s30  ;;  %v343_v24 = vsel %vm338_vm1, %v327_v22, %v329_v18  ;;  %v2669_v22 = vld [vmem:[%s2774_s21 + $0x20] sm:$0xff]  }
  0x8f   : > { %1174 = vrot.lane.b32.xlu1 %v2782_v0, %s2724_s5  ;;  %373 = vmatpush1.bf16.msra.mxu0 %v343_v24 }
  0x90   : > { %v323_v25 = vpop.permute.xlu0 %322 }
  0x91   : > { %v325_v26 = vpop.permute.xlu1 %324 }
  0x92   : > { %v342_v27 = vsel %vm338_vm1, %v323_v25, %v325_v26  ;;  %1176 = vrot.lane.b32.xlu0 %v2790_v2, %s2724_s5 }
  0x93   : > { %374 = vmatprep.subr.bf16.mxu0 %v342_v27  ;;  %1172 = vrot.lane.b32.xlu1 %v2785_v1, %s2724_s5  ;;  %v2670_v27 = vld [vmem:[%s2774_s21 + $0x30] sm:$0xff]  }
  0x94   : > { %v321_v28 = vpop.permute.xlu0 %320 }
  0x95   : > { %v317_v29 = vpop.permute.xlu1 %316  ;;  %v341_v30 = vsel %vm338_vm1, %v321_v28, %v323_v25 }
  0x96   : > { %375 = vmatpush1.bf16.msra.mxu0 %v341_v30  ;;  %1045 = vrot.lane.b32.xlu0 %v2796_v3, %s2723_s30  ;;  %v2671_v30 = vld [vmem:[%s2774_s21 + $0x28] sm:$0xff]  }
  0x97   : > { %1047 = vrot.lane.b32.xlu1 %v2806_v5, %s2723_s30 }
  0x98   : > { %v319_v31 = vpop.permute.xlu0 %318 }
  0x99   : > { %v315_v32 = vpop.permute.xlu1 %314  ;;  %v340_v33 = vsel %vm338_vm1, %v317_v29, %v319_v31 }
  0x9a   : > { %376 = vmatprep.subr.bf16.mxu0 %v340_v33  ;;  %1043 = vrot.lane.b32.xlu0 %v2800_v4, %s2723_s30  ;;  %v339_v34 = vsel %vm338_vm1, %v315_v32, %v317_v29 }
  0x9b   : > { %1168 = vrot.lane.b32.xlu1 %v2796_v3, %s2724_s5  ;;  %377 = vmatpush1.bf16.msra.mxu0 %v339_v34 }
  0x9c   : > { %v560_v36 = vpop.permute.xlu0 %559 }
  0x9d   : > { %v562_v37 = vpop.permute.xlu1 %561 }
  0x9e   : > { %1170 = vrot.lane.b32.xlu0 %v2806_v5, %s2724_s5  ;;  %v571_v38 = vsel %vm563_vm2, %v560_v36, %v562_v37  ;;  %2479 = vmatmul.mubr.msk.bf16.vlgmr.msra.gmra.mxu0 %vm355_vm0, %v2665_v35 }
  0x9f   : > { %1166 = vrot.lane.b32.xlu1 %v2800_v4, %s2724_s5  ;;  %594 = vmatprep.subr.bf16.mxu0 %v571_v38 }
  0xa0   : > { %v558_v39 = vpop.permute.xlu0 %557  ;;  %404 = vmatprep.mubr.bf16.mxu0 %v2718_v12 }
  0xa1   : > { %v570_v40 = vsel %vm563_vm2, %v558_v39, %v560_v36  ;;  %v683_v41 = vpop.permute.xlu1 %682  ;;  %v2672_v36 = vld [vmem:[%s2774_s21 + $0x38] sm:$0xff]  }
  0xa2   : > { %1039 = vrot.lane.b32.xlu0 %v2809_v6, %s2723_s30  ;;  %595 = vmatpush1.bf16.msra.mxu0 %v570_v40 }
  0xa3   : > { %1041 = vrot.lane.b32.xlu1 %v2819_v8, %s2723_s30 }
  0xa4   : > { %v685_v42 = vpop.permute.xlu0 %684 }
  0xa5   : > { %v681_v44 = vpop.permute.xlu1 %680  ;;  %v694_v45 = vsel %vm686_vm3, %v683_v41, %v685_v42 }
  0xa6   : > { %v693_v46 = vsel %vm686_vm3, %v681_v44, %v683_v41  ;;  %1037 = vrot.lane.b32.xlu0 %v2815_v7, %s2723_s30  ;;  %717 = vmatprep.subr.bf16.mxu1 %v694_v45 }
  0xa7   : > { %1162 = vrot.lane.b32.xlu1 %v2809_v6, %s2724_s5  ;;  %718 = vmatpush1.bf16.msra.mxu1 %v693_v46 }
  0xa8   : > { %v554_v47 = vpop.permute.xlu0 %553  ;;  %2480 = vmatmul.mubr.msk.bf16.gmra.mxu0 %vm355_vm0, %v2667_v43 }
  0xa9   : > { %v556_v48 = vpop.permute.xlu1 %555  ;;  %618 = vmatprep.mubr.bf16.mxu0 %v2718_v12 }
  0xaa   : > { %1164 = vrot.lane.b32.xlu0 %v2819_v8, %s2724_s5  ;;  %v569_v49 = vsel %vm563_vm2, %v554_v47, %v556_v48 }
  0xab   : > { %1160 = vrot.lane.b32.xlu1 %v2815_v7, %s2724_s5  ;;  %596 = vmatprep.subr.bf16.mxu0 %v569_v49 }
  0xac   : > { %v552_v50 = vpop.permute.xlu0 %551 }
  0xad   : > { %v568_v51 = vsel %vm563_vm2, %v552_v50, %v554_v47  ;;  %v677_v52 = vpop.permute.xlu1 %676 }
  0xae   : > { %1033 = vrot.lane.b32.xlu0 %v2822_v9, %s2723_s30  ;;  %597 = vmatpush1.bf16.msra.mxu0 %v568_v51 }
  0xaf   : > { %1035 = vrot.lane.b32.xlu1 %v2841_v11, %s2723_s30 }
  0xb0   : > { %v679_v53 = vpop.permute.xlu0 %678 }
  0xb1   : > { %v675_v54 = vpop.permute.xlu1 %674  ;;  %v692_v55 = vsel %vm686_vm3, %v677_v52, %v679_v53 }
  0xb2   : > { %v691_v56 = vsel %vm686_vm3, %v675_v54, %v677_v52  ;;  %1031 = vrot.lane.b32.xlu0 %v2831_v10, %s2723_s30  ;;  %719 = vmatprep.subr.bf16.mxu1 %v692_v55 }
  0xb3   : > { %1156 = vrot.lane.b32.xlu1 %v2822_v9, %s2724_s5  ;;  %720 = vmatpush1.bf16.msra.mxu1 %v691_v56 }
  0xb4   : > { %v548_v57 = vpop.permute.xlu0 %547 }
  0xb5   : > { %v550_v58 = vpop.permute.xlu1 %549 }
  0xb6   : > { %1158 = vrot.lane.b32.xlu0 %v2841_v11, %s2724_s5  ;;  %v567_v59 = vsel %vm563_vm2, %v548_v57, %v550_v58 }
  0xb7   : > { %1154 = vrot.lane.b32.xlu1 %v2831_v10, %s2724_s5  ;;  %598 = vmatprep.subr.bf16.mxu0 %v567_v59 }
  0xb8   : > { %v546_v60 = vpop.permute.xlu0 %545 }
  0xb9   : > { %v566_v61 = vsel %vm563_vm2, %v546_v60, %v548_v57  ;;  %v671_v62 = vpop.permute.xlu1 %670 }
  0xba   : > { %1297 = vrot.lane.b32.xlu0 %v2782_v0, %s2725_s6  ;;  %599 = vmatpush1.bf16.msra.mxu0 %v566_v61 }
  0xbb   : > { %1299 = vrot.lane.b32.xlu1 %v2790_v2, %s2725_s6 }
  0xbc   : > { %v673_v63 = vpop.permute.xlu0 %672 }
  0xbd   : > { %v669_v13 = vpop.permute.xlu1 %668  ;;  %v690_v14 = vsel %vm686_vm3, %v671_v62, %v673_v63 }
  0xbe   : > { %v689_v15 = vsel %vm686_vm3, %v669_v13, %v671_v62  ;;  %1295 = vrot.lane.b32.xlu0 %v2785_v1, %s2725_s6  ;;  %721 = vmatprep.subr.bf16.mxu1 %v690_v14 }
  0xbf   : > { %1420 = vrot.lane.b32.xlu1 %v2782_v0, %s2726_s7  ;;  %722 = vmatpush1.bf16.msra.mxu1 %v689_v15  ;;  %v2673_v15 = vld [vmem:[%s2774_s21 + $0x40] sm:$0xff]  }
  0xc0   : > { %v542_v16 = vpop.permute.xlu0 %541 }
  0xc1   : > { %v544_v17 = vpop.permute.xlu1 %543 }
  0xc2   : > { %1422 = vrot.lane.b32.xlu0 %v2790_v2, %s2726_s7  ;;  %v565_v18 = vsel %vm563_vm2, %v542_v16, %v544_v17 }
  0xc3   : > { %1418 = vrot.lane.b32.xlu1 %v2785_v1, %s2726_s7  ;;  %600 = vmatprep.subr.bf16.mxu0 %v565_v18 }
  0xc4   : > { %v540_v19 = vpop.permute.xlu0 %539 }
  0xc5   : > { %v564_v20 = vsel %vm563_vm2, %v540_v19, %v542_v16  ;;  %v665_v21 = vpop.permute.xlu1 %664 }
  0xc6   : > { %1291 = vrot.lane.b32.xlu0 %v2796_v3, %s2725_s6  ;;  %601 = vmatpush1.bf16.msra.mxu0 %v564_v20  ;;  %v2674_v20 = vld [vmem:[%s2774_s21 + $0x50] sm:$0xff]  }
  0xc7   : > { %1293 = vrot.lane.b32.xlu1 %v2806_v5, %s2725_s6 }
  0xc8   : > { %v667_v23 = vpop.permute.xlu0 %666 }
  0xc9   : > { %v663_v24 = vpop.permute.xlu1 %662  ;;  %v688_v25 = vsel %vm686_vm3, %v665_v21, %v667_v23  ;;  %2499 = vmatmul.mubr.msk.bf16.vlgmr.msra.gmra.mxu0 %vm355_vm0, %v2669_v22  ;;  %v2675_v23 = vld [vmem:[%s2774_s21 + $0x48] sm:$0xff]  }
  0xca   : > { %v687_v26 = vsel %vm686_vm3, %v663_v24, %v665_v21  ;;  %1289 = vrot.lane.b32.xlu0 %v2800_v4, %s2725_s6  ;;  %723 = vmatprep.subr.bf16.mxu1 %v688_v25 }
  0xcb   : > { %1414 = vrot.lane.b32.xlu1 %v2796_v3, %s2726_s7  ;;  %724 = vmatpush1.bf16.msra.mxu1 %v687_v26 }
  0xcc   : > { %v806_v28 = vpop.permute.xlu0 %805  ;;  %628 = vmatprep.mubr.bf16.mxu0 %v2718_v12 }
  0xcd   : > { %v808_v29 = vpop.permute.xlu1 %807 }
  0xce   : > { %1416 = vrot.lane.b32.xlu0 %v2806_v5, %s2726_s7  ;;  %v817_v31 = vsel %vm809_vm4, %v806_v28, %v808_v29  ;;  %2507 = vmatmul.mubr.msk.bf16.vlgmr.msra.gmra.mxu1 %vm355_vm0, %v2670_v27  ;;  %v2676_v29 = vld [vmem:[%s2774_s21 + $0x58] sm:$0xff]  }
  0xcf   : > { %1412 = vrot.lane.b32.xlu1 %v2800_v4, %s2726_s7  ;;  %840 = vmatprep.subr.bf16.mxu0 %v817_v31 }
  0xd0   : > { %v804_v32 = vpop.permute.xlu0 %803  ;;  %751 = vmatprep.mubr.bf16.mxu1 %v2718_v12 }
  0xd1   : > { %v816_v33 = vsel %vm809_vm4, %v804_v32, %v806_v28  ;;  %v929_v34 = vpop.permute.xlu1 %928  ;;  %2500 = vmatmul.mubr.msk.bf16.gmra.mxu0 %vm355_vm0, %v2671_v30 }
  0xd2   : > { %1285 = vrot.lane.b32.xlu0 %v2809_v6, %s2725_s6  ;;  %841 = vmatpush1.bf16.msra.mxu0 %v816_v33 }
  0xd3   : > { %1287 = vrot.lane.b32.xlu1 %v2819_v8, %s2725_s6  ;;  %864 = vmatprep.mubr.bf16.mxu0 %v2718_v12 }
  0xd4   : > { %v931_v35 = vpop.permute.xlu0 %930 }
  0xd5   : > { %v927_v37 = vpop.permute.xlu1 %926  ;;  %v940_v38 = vsel %vm932_vm5, %v929_v34, %v931_v35 }
  0xd6   : > { %v939_v39 = vsel %vm932_vm5, %v927_v37, %v929_v34  ;;  %1283 = vrot.lane.b32.xlu0 %v2815_v7, %s2725_s6  ;;  %963 = vmatprep.subr.bf16.mxu1 %v940_v38 }
  0xd7   : > { %1408 = vrot.lane.b32.xlu1 %v2809_v6, %s2726_s7  ;;  %964 = vmatpush1.bf16.msra.mxu1 %v939_v39 }
  0xd8   : > { %v800_v40 = vpop.permute.xlu0 %799  ;;  %2508 = vmatmul.mubr.msk.bf16.gmra.mxu1 %vm355_vm0, %v2672_v36 }
  0xd9   : > { %v802_v41 = vpop.permute.xlu1 %801  ;;  %987 = vmatprep.mubr.bf16.mxu1 %v2718_v12 }
  0xda   : > { %1410 = vrot.lane.b32.xlu0 %v2819_v8, %s2726_s7  ;;  %v815_v42 = vsel %vm809_vm4, %v800_v40, %v802_v41 }
  0xdb   : > { %1406 = vrot.lane.b32.xlu1 %v2815_v7, %s2726_s7  ;;  %842 = vmatprep.subr.bf16.mxu0 %v815_v42 }
  0xdc   : > { %v798_v43 = vpop.permute.xlu0 %797 }
  0xdd   : > { %v814_v44 = vsel %vm809_vm4, %v798_v43, %v800_v40  ;;  %v923_v45 = vpop.permute.xlu1 %922 }
  0xde   : > { %1279 = vrot.lane.b32.xlu0 %v2822_v9, %s2725_s6  ;;  %843 = vmatpush1.bf16.msra.mxu0 %v814_v44 }
  0xdf   : > { %1281 = vrot.lane.b32.xlu1 %v2841_v11, %s2725_s6 }
  0xe0   : > { %v925_v46 = vpop.permute.xlu0 %924 }
  0xe1   : > { %v921_v47 = vpop.permute.xlu1 %920  ;;  %v938_v48 = vsel %vm932_vm5, %v923_v45, %v925_v46 }
  0xe2   : > { %v937_v49 = vsel %vm932_vm5, %v921_v47, %v923_v45  ;;  %1277 = vrot.lane.b32.xlu0 %v2831_v10, %s2725_s6  ;;  %965 = vmatprep.subr.bf16.mxu1 %v938_v48  ;;  %s2612_s6 = sshll.u32 %s3624_s16, 6 }
  0xe3   : > { %1402 = vrot.lane.b32.xlu1 %v2822_v9, %s2726_s7  ;;  %966 = vmatpush1.bf16.msra.mxu1 %v937_v49 }
  0xe4   : > { %v794_v50 = vpop.permute.xlu0 %793 }
  0xe5   : > { %v796_v51 = vpop.permute.xlu1 %795 }
  0xe6   : > { %1404 = vrot.lane.b32.xlu0 %v2841_v11, %s2726_s7  ;;  %v813_v52 = vsel %vm809_vm4, %v794_v50, %v796_v51 }
  0xe7   : > { %1400 = vrot.lane.b32.xlu1 %v2831_v10, %s2726_s7  ;;  %844 = vmatprep.subr.bf16.mxu0 %v813_v52 }
  0xe8   : > { %v792_v53 = vpop.permute.xlu0 %791 }
  0xe9   : > { %v812_v54 = vsel %vm809_vm4, %v792_v53, %v794_v50  ;;  %v917_v55 = vpop.permute.xlu1 %916 }
  0xea   : > { %1543 = vrot.lane.b32.xlu0 %v2782_v0, %s2727_s8  ;;  %845 = vmatpush1.bf16.msra.mxu0 %v812_v54 }
  0xeb   : > { %1545 = vrot.lane.b32.xlu1 %v2790_v2, %s2727_s8 }
  0xec   : > { %v919_v56 = vpop.permute.xlu0 %918 }
  0xed   : > { %v915_v57 = vpop.permute.xlu1 %914  ;;  %v936_v58 = vsel %vm932_vm5, %v917_v55, %v919_v56 }
  0xee   : > { %v935_v59 = vsel %vm932_vm5, %v915_v57, %v917_v55  ;;  %1541 = vrot.lane.b32.xlu0 %v2785_v1, %s2727_s8  ;;  %967 = vmatprep.subr.bf16.mxu1 %v936_v58 }
  0xef   : > { %1666 = vrot.lane.b32.xlu1 %v2782_v0, %s2728_s9  ;;  %968 = vmatpush1.bf16.msra.mxu1 %v935_v59  ;;  %v2677_v59 = vld [vmem:[%s2774_s21 + $0x60] sm:$0xff]  }
  0xf0   : > { %v788_v60 = vpop.permute.xlu0 %787 }
  0xf1   : > { %v790_v61 = vpop.permute.xlu1 %789 }
  0xf2   : > { %1668 = vrot.lane.b32.xlu0 %v2790_v2, %s2728_s9  ;;  %v811_v62 = vsel %vm809_vm4, %v788_v60, %v790_v61  ;;  %v2678_v61 = vld [vmem:[%s2774_s21 + $0x70] sm:$0xff]  }
  0xf3   : > { %1664 = vrot.lane.b32.xlu1 %v2785_v1, %s2728_s9  ;;  %846 = vmatprep.subr.bf16.mxu0 %v811_v62 }
  0xf4   : > { %v786_v63 = vpop.permute.xlu0 %785 }
  0xf5   : > { %v810_v13 = vsel %vm809_vm4, %v786_v63, %v788_v60  ;;  %v911_v14 = vpop.permute.xlu1 %910 }
  0xf6   : > { %1537 = vrot.lane.b32.xlu0 %v2796_v3, %s2727_s8  ;;  %847 = vmatpush1.bf16.msra.mxu0 %v810_v13  ;;  %v2679_v13 = vld [vmem:[%s2774_s21 + $0x68] sm:$0xff]  }
  0xf7   : > { %1539 = vrot.lane.b32.xlu1 %v2806_v5, %s2727_s8 }
  0xf8   : > { %v913_v16 = vpop.permute.xlu0 %912 }
  0xf9   : > { %v909_v17 = vpop.permute.xlu1 %908  ;;  %v934_v18 = vsel %vm932_vm5, %v911_v14, %v913_v16  ;;  %2515 = vmatmul.mubr.msk.bf16.vlgmr.msra.gmra.mxu0 %vm355_vm0, %v2673_v15 }
  0xfa   : > { %v933_v19 = vsel %vm932_vm5, %v909_v17, %v911_v14  ;;  %1535 = vrot.lane.b32.xlu0 %v2800_v4, %s2727_s8  ;;  %969 = vmatprep.subr.bf16.mxu1 %v934_v18 }
  0xfb   : > { %1660 = vrot.lane.b32.xlu1 %v2796_v3, %s2728_s9  ;;  %970 = vmatpush1.bf16.msra.mxu1 %v933_v19 }
  0xfc   : > { %v1052_v21 = vpop.permute.xlu0 %1051  ;;  %874 = vmatprep.mubr.bf16.mxu0 %v2718_v12 }
  0xfd   : > { %v1054_v22 = vpop.permute.xlu1 %1053 }
  0xfe   : > { %1662 = vrot.lane.b32.xlu0 %v2806_v5, %s2728_s9  ;;  %v1063_v24 = vsel %vm1055_vm6, %v1052_v21, %v1054_v22  ;;  %2523 = vmatmul.mubr.msk.bf16.vlgmr.msra.gmra.mxu1 %vm355_vm0, %v2674_v20 }
  0xff   : > { %1658 = vrot.lane.b32.xlu1 %v2800_v4, %s2728_s9  ;;  %1086 = vmatprep.subr.bf16.mxu0 %v1063_v24 }
 0x100   : > { %v1050_v25 = vpop.permute.xlu0 %1049  ;;  %997 = vmatprep.mubr.bf16.mxu1 %v2718_v12 }
 0x101   : > { %v1062_v26 = vsel %vm1055_vm6, %v1050_v25, %v1052_v21  ;;  %v1175_v27 = vpop.permute.xlu1 %1174  ;;  %2516 = vmatmul.mubr.msk.bf16.gmra.mxu0 %vm355_vm0, %v2675_v23 }
 0x102   : > { %1531 = vrot.lane.b32.xlu0 %v2809_v6, %s2727_s8  ;;  %1087 = vmatpush1.bf16.msra.mxu0 %v1062_v26 }
 0x103   : > { %1533 = vrot.lane.b32.xlu1 %v2819_v8, %s2727_s8  ;;  %1110 = vmatprep.mubr.bf16.mxu0 %v2718_v12 }
 0x104   : > { %v1177_v28 = vpop.permute.xlu0 %1176 }
 0x105   : > { %v1173_v30 = vpop.permute.xlu1 %1172  ;;  %v1186_v31 = vsel %vm1178_vm7, %v1175_v27, %v1177_v28 }
 0x106   : > { %v1185_v32 = vsel %vm1178_vm7, %v1173_v30, %v1175_v27  ;;  %1529 = vrot.lane.b32.xlu0 %v2815_v7, %s2727_s8  ;;  %1209 = vmatprep.subr.bf16.mxu1 %v1186_v31 }
 0x107   : > { %1654 = vrot.lane.b32.xlu1 %v2809_v6, %s2728_s9  ;;  %1210 = vmatpush1.bf16.msra.mxu1 %v1185_v32 }
 0x108   : > { %v1046_v33 = vpop.permute.xlu0 %1045  ;;  %2524 = vmatmul.mubr.msk.bf16.gmra.mxu1 %vm355_vm0, %v2676_v29 }
 0x109   : > { %v1048_v34 = vpop.permute.xlu1 %1047  ;;  %1233 = vmatprep.mubr.bf16.mxu1 %v2718_v12 }
 0x10a   : > { %1656 = vrot.lane.b32.xlu0 %v2819_v8, %s2728_s9  ;;  %v1061_v35 = vsel %vm1055_vm6, %v1046_v33, %v1048_v34  ;;  %v2699_v34 = vld [vmem:[%s2779_s24 + $0x50] ss:$12 sps:$4 sm:$0xff]  }
 0x10b   : > { %1652 = vrot.lane.b32.xlu1 %v2815_v7, %s2728_s9  ;;  %1088 = vmatprep.subr.bf16.mxu0 %v1061_v35 }
 0x10c   : > { %v1044_v36 = vpop.permute.xlu0 %1043 }
 0x10d   : > { %v1060_v37 = vsel %vm1055_vm6, %v1044_v36, %v1046_v33  ;;  %v1169_v38 = vpop.permute.xlu1 %1168  ;;  %v2698_v33 = vld [vmem:[%s2779_s24 + $0x4c] ss:$12 sps:$4 sm:$0xff]  }
 0x10e   : > { %1525 = vrot.lane.b32.xlu0 %v2822_v9, %s2727_s8  ;;  %1089 = vmatpush1.bf16.msra.mxu0 %v1060_v37 }
 0x10f   : > { %1527 = vrot.lane.b32.xlu1 %v2841_v11, %s2727_s8 }
 0x110   : > { %v1171_v39 = vpop.permute.xlu0 %1170 }
 0x111   : > { %v1167_v40 = vpop.permute.xlu1 %1166  ;;  %v1184_v41 = vsel %vm1178_vm7, %v1169_v38, %v1171_v39 }
 0x112   : > { %v1183_v42 = vsel %vm1178_vm7, %v1167_v40, %v1169_v38  ;;  %1523 = vrot.lane.b32.xlu0 %v2831_v10, %s2727_s8  ;;  %1211 = vmatprep.subr.bf16.mxu1 %v1184_v41 }
 0x113   : > { %1648 = vrot.lane.b32.xlu1 %v2822_v9, %s2728_s9  ;;  %1212 = vmatpush1.bf16.msra.mxu1 %v1183_v42 }
 0x114   : > { %v1040_v43 = vpop.permute.xlu0 %1039 }
 0x115   : > { %v1042_v44 = vpop.permute.xlu1 %1041 }
 0x116   : > { %1650 = vrot.lane.b32.xlu0 %v2841_v11, %s2728_s9  ;;  %v1059_v45 = vsel %vm1055_vm6, %v1040_v43, %v1042_v44  ;;  %v2681_v44 = vld [vmem:[%s2774_s21 + $0x80] sm:$0xff]  }
 0x117   : > { %1646 = vrot.lane.b32.xlu1 %v2831_v10, %s2728_s9  ;;  %1090 = vmatprep.subr.bf16.mxu0 %v1059_v45  ;;  %v2701_v45 = vld [vmem:[%s2779_s24 + $0x34] ss:$12 sps:$4 sm:$0xff]   ;;  %s217_s9 = scalar_lea.vmem %s3599_s4, %s2612_s6 }
 0x118   : > { %v1038_v46 = vpop.permute.xlu0 %1037 }
 0x119   : > { %v1058_v47 = vsel %vm1055_vm6, %v1038_v46, %v1040_v43  ;;  %v1163_v48 = vpop.permute.xlu1 %1162  ;;  %v2702_v46 = vld [vmem:[%s2779_s24 + $0x38] ss:$12 sps:$4 sm:$0xff]  }
 0x11a   : > { %1789 = vrot.lane.b32.xlu0 %v2782_v0, %s2729_s10  ;;  %1091 = vmatpush1.bf16.msra.mxu0 %v1058_v47 }
 0x11b   : > { %1791 = vrot.lane.b32.xlu1 %v2790_v2, %s2729_s10 }
 0x11c   : > { %v1165_v49 = vpop.permute.xlu0 %1164 }
 0x11d   : > { %v1161_v50 = vpop.permute.xlu1 %1160  ;;  %v1182_v51 = vsel %vm1178_vm7, %v1163_v48, %v1165_v49 }
 0x11e   : > { %v1181_v52 = vsel %vm1178_vm7, %v1161_v50, %v1163_v48  ;;  %1787 = vrot.lane.b32.xlu0 %v2785_v1, %s2729_s10  ;;  %1213 = vmatprep.subr.bf16.mxu1 %v1182_v51  ;;  %v2703_v51 = vld [vmem:[%s2779_s24 + $0x30] ss:$12 sps:$4 sm:$0xff]  }
 0x11f   : > { %1912 = vrot.lane.b32.xlu1 %v2782_v0, %s2730_s11  ;;  %1214 = vmatpush1.bf16.msra.mxu1 %v1181_v52  ;;  %v2682_v52 = vld [vmem:[%s2774_s21 + $0x90] sm:$0xff]  }
 0x120   : > { %v1034_v53 = vpop.permute.xlu0 %1033 }
 0x121   : > { %v1036_v54 = vpop.permute.xlu1 %1035 }
 0x122   : > { %1914 = vrot.lane.b32.xlu0 %v2790_v2, %s2730_s11  ;;  %v1057_v55 = vsel %vm1055_vm6, %v1034_v53, %v1036_v54 }
 0x123   : > { %1910 = vrot.lane.b32.xlu1 %v2785_v1, %s2730_s11  ;;  %1092 = vmatprep.subr.bf16.mxu0 %v1057_v55  ;;  %v2683_v55 = vld [vmem:[%s2774_s21 + $0x88] sm:$0xff]  }
 0x124   : > { %v1032_v56 = vpop.permute.xlu0 %1031 }
 0x125   : > { %v1056_v57 = vsel %vm1055_vm6, %v1032_v56, %v1034_v53  ;;  %v1157_v58 = vpop.permute.xlu1 %1156 }
 0x126   : > { %1783 = vrot.lane.b32.xlu0 %v2796_v3, %s2729_s10  ;;  %1093 = vmatpush1.bf16.msra.mxu0 %v1056_v57 }
 0x127   : > { %1785 = vrot.lane.b32.xlu1 %v2806_v5, %s2729_s10 }
 0x128   : > { %v1159_v0 = vpop.permute.xlu0 %1158 }
 0x129   : > { %v1155_v2 = vpop.permute.xlu1 %1154  ;;  %v1180_v60 = vsel %vm1178_vm7, %v1157_v58, %v1159_v0  ;;  %2531 = vmatmul.mubr.msk.bf16.vlgmr.msra.gmra.mxu0 %vm355_vm0, %v2677_v59  ;;  %v2704_v0 = vld [vmem:[%s2779_s24 + $0x1c] ss:$12 sps:$4 sm:$0xff]  }
 0x12a   : > { %v1179_v1 = vsel %vm1178_vm7, %v1155_v2, %v1157_v58  ;;  %1781 = vrot.lane.b32.xlu0 %v2800_v4, %s2729_s10  ;;  %1215 = vmatprep.subr.bf16.mxu1 %v1180_v60  ;;  %v2705_v2 = vld [vmem:[%s2779_s24 + $0x20] ss:$12 sps:$4 sm:$0xff]  }
 0x12b   : > { %1906 = vrot.lane.b32.xlu1 %v2796_v3, %s2730_s11  ;;  %1216 = vmatpush1.bf16.msra.mxu1 %v1179_v1  ;;  %v2684_v1 = vld [vmem:[%s2774_s21 + $0x98] sm:$0xff]  }
 0x12c   : > { %v1298_v62 = vpop.permute.xlu0 %1297  ;;  %1120 = vmatprep.mubr.bf16.mxu0 %v2718_v12 }
 0x12d   : > { %v1300_v63 = vpop.permute.xlu1 %1299 }
 0x12e   : > { %1908 = vrot.lane.b32.xlu0 %v2806_v5, %s2730_s11  ;;  %v1309_v14 = vsel %vm1301_vm8, %v1298_v62, %v1300_v63  ;;  %2539 = vmatmul.mubr.msk.bf16.vlgmr.msra.gmra.mxu1 %vm355_vm0, %v2678_v61  ;;  %v2680_v5 = vld [vmem:[%s2774_s21 + $0x78] sm:$0xff]  }
 0x12f   : > { %1904 = vrot.lane.b32.xlu1 %v2800_v4, %s2730_s11  ;;  %1332 = vmatprep.subr.bf16.mxu0 %v1309_v14 }
 0x130   : > { %v1296_v3 = vpop.permute.xlu0 %1295  ;;  %1243 = vmatprep.mubr.bf16.mxu1 %v2718_v12 }
 0x131   : > { %v1308_v15 = vsel %vm1301_vm8, %v1296_v3, %v1298_v62  ;;  %v1421_v16 = vpop.permute.xlu1 %1420  ;;  %2532 = vmatmul.mubr.msk.bf16.gmra.mxu0 %vm355_vm0, %v2679_v13  ;;  %v2706_v13 = vld [vmem:[%s2779_s24 + $0x18] ss:$12 sps:$4 sm:$0xff]  }
 0x132   : > { %1777 = vrot.lane.b32.xlu0 %v2809_v6, %s2729_s10  ;;  %1333 = vmatpush1.bf16.msra.mxu0 %v1308_v15 }
 0x133   : > { %1779 = vrot.lane.b32.xlu1 %v2819_v8, %s2729_s10  ;;  %1356 = vmatprep.mubr.bf16.mxu0 %v2718_v12 }
 0x134   : > { %v1423_v4 = vpop.permute.xlu0 %1422 }
 0x135   : > { %v1419_v17 = vpop.permute.xlu1 %1418  ;;  %v1432_v18 = vsel %vm1424_vm9, %v1421_v16, %v1423_v4 }
 0x136   : > { %v1431_v19 = vsel %vm1424_vm9, %v1419_v17, %v1421_v16  ;;  %1775 = vrot.lane.b32.xlu0 %v2815_v7, %s2729_s10  ;;  %1455 = vmatprep.subr.bf16.mxu1 %v1432_v18  ;;  %v2707_v17 = vld [vmem:[%s2779_s24 + $0x8] ss:$12 sps:$4 sm:$0xff]  }
 0x137   : > { %1900 = vrot.lane.b32.xlu1 %v2809_v6, %s2730_s11  ;;  %1456 = vmatpush1.bf16.msra.mxu1 %v1431_v19 }
 0x138   : > { %v1292_v20 = vpop.permute.xlu0 %1291  ;;  %2540 = vmatmul.mubr.msk.bf16.gmra.mxu1 %vm355_vm0, %v2680_v5 }
 0x139   : > { %v1294_v21 = vpop.permute.xlu1 %1293  ;;  %1479 = vmatprep.mubr.bf16.mxu1 %v2718_v12 }
 0x13a   : > { %1902 = vrot.lane.b32.xlu0 %v2819_v8, %s2730_s11  ;;  %v1307_v22 = vsel %vm1301_vm8, %v1292_v20, %v1294_v21 }
 0x13b   : > { %1898 = vrot.lane.b32.xlu1 %v2815_v7, %s2730_s11  ;;  %1334 = vmatprep.subr.bf16.mxu0 %v1307_v22  ;;  %v3200_v7 = vld [vmem:[%s2779_s24 + $0x4] ss:$12 sps:$4 sm:$0xff]   ;;  %v2708_v22 = vld [vmem:[%s2779_s24] ss:$12 sps:$4 sm:$0xff]  }
 0x13c   : > { %v1290_v23 = vpop.permute.xlu0 %1289 }
 0x13d   : > { %v1306_v6 = vsel %vm1301_vm8, %v1290_v23, %v1292_v20  ;;  %v1415_v24 = vpop.permute.xlu1 %1414 }
 0x13e   : > { %1771 = vrot.lane.b32.xlu0 %v2822_v9, %s2729_s10  ;;  %1335 = vmatpush1.bf16.msra.mxu0 %v1306_v6 }
 0x13f   : > { %1773 = vrot.lane.b32.xlu1 %v2841_v11, %s2729_s10 }
 0x140   : > { %v1417_v25 = vpop.permute.xlu0 %1416 }
 0x141   : > { %v1413_v8 = vpop.permute.xlu1 %1412  ;;  %v1430_v26 = vsel %vm1424_vm9, %v1415_v24, %v1417_v25 }
 0x142   : > { %v1429_v27 = vsel %vm1424_vm9, %v1413_v8, %v1415_v24  ;;  %1769 = vrot.lane.b32.xlu0 %v2831_v10, %s2729_s10  ;;  %1457 = vmatprep.subr.bf16.mxu1 %v1430_v26  ;;  %v505_v8 = vpop.f32.mrf.mxu1 }
 0x143   : > { %1894 = vrot.lane.b32.xlu1 %v3200_v7, %s2730_s11  ;;  %1458 = vmatpush1.bf16.msra.mxu1 %v1429_v27 }
 0x144   : > { %v1286_v9 = vpop.permute.xlu0 %1285 }
 0x145   : > { %v1288_v28 = vpop.permute.xlu1 %1287 }
 0x146   : > { %1896 = vrot.lane.b32.xlu0 %v2841_v11, %s2730_s11  ;;  %v1305_v29 = vsel %vm1301_vm8, %v1286_v9, %v1288_v28 }
 0x147   : > { %1892 = vrot.lane.b32.xlu1 %v2831_v10, %s2730_s11  ;;  %1336 = vmatprep.subr.bf16.mxu0 %v1305_v29  ;;  %v2700_v10 = vld [vmem:[%s2779_s24 + $0x48] ss:$12 sps:$4 sm:$0xff]  }
 0x148   : > { %v1284_v30 = vpop.permute.xlu0 %1283 }
 0x149   : > { %v1304_v31 = vsel %vm1301_vm8, %v1284_v30, %v1286_v9  ;;  %v1409_v32 = vpop.permute.xlu1 %1408  ;;  %v507_v30 = vpop.f32.mrf.mxu1 }
 0x14a   : > { %2035 = vrot.lane.b32.xlu0 %v2698_v33, %s2731_s12  ;;  %1337 = vmatpush1.bf16.msra.mxu0 %v1304_v31 }
 0x14b   : > { %2037 = vrot.lane.b32.xlu1 %v2699_v34, %s2731_s12 }
 0x14c   : > { %v1411_v11 = vpop.permute.xlu0 %1410 }
 0x14d   : > { %v1407_v35 = vpop.permute.xlu1 %1406  ;;  %v1428_v36 = vsel %vm1424_vm9, %v1409_v32, %v1411_v11 }
 0x14e   : > { %v1427_v37 = vsel %vm1424_vm9, %v1407_v35, %v1409_v32  ;;  %2033 = vrot.lane.b32.xlu0 %v2700_v10, %s2731_s12  ;;  %1459 = vmatprep.subr.bf16.mxu1 %v1428_v36  ;;  %v509_v32 = vpop.f32.mrf.mxu1 }
 0x14f   : > { %2158 = vrot.lane.b32.xlu1 %v2698_v33, %s2732_s13  ;;  %1460 = vmatpush1.bf16.msra.mxu1 %v1427_v37 }
 0x150   : > { %v1280_v38 = vpop.permute.xlu0 %1279  ;;  %v511_v37 = vpop.f32.mrf.mxu1 }
 0x151   : > { %v1282_v39 = vpop.permute.xlu1 %1281 }
 0x152   : > { %2160 = vrot.lane.b32.xlu0 %v2699_v34, %s2732_s13  ;;  %v1303_v40 = vsel %vm1301_vm8, %v1280_v38, %v1282_v39 }
 0x153   : > { %2156 = vrot.lane.b32.xlu1 %v2700_v10, %s2732_s13  ;;  %1338 = vmatprep.subr.bf16.mxu0 %v1303_v40  ;;  %v515_v40 = vpop.f32.mrf.mxu1 }
 0x154   : > { %v1278_v41 = vpop.permute.xlu0 %1277 }
 0x155   : > { %v1302_v42 = vsel %vm1301_vm8, %v1278_v41, %v1280_v38  ;;  %v1403_v43 = vpop.permute.xlu1 %1402 }
 0x156   : > { %2029 = vrot.lane.b32.xlu0 %v2701_v45, %s2731_s12  ;;  %1339 = vmatpush1.bf16.msra.mxu0 %v1302_v42 }
 0x157   : > { %2031 = vrot.lane.b32.xlu1 %v2702_v46, %s2731_s12 }
 0x158   : > { %v1405_v47 = vpop.permute.xlu0 %1404 }
 0x159   : > { %v1401_v48 = vpop.permute.xlu1 %1400  ;;  %v1426_v49 = vsel %vm1424_vm9, %v1403_v43, %v1405_v47  ;;  %2547 = vmatmul.mubr.msk.bf16.vlgmr.msra.gmra.mxu0 %vm355_vm0, %v2681_v44 }
 0x15a   : > { %v1425_v50 = vsel %vm1424_vm9, %v1401_v48, %v1403_v43  ;;  %2027 = vrot.lane.b32.xlu0 %v2703_v51, %s2731_s12  ;;  %1461 = vmatprep.subr.bf16.mxu1 %v1426_v49 }
 0x15b   : > { %2152 = vrot.lane.b32.xlu1 %v2701_v45, %s2732_s13  ;;  %1462 = vmatpush1.bf16.msra.mxu1 %v1425_v50  ;;  %v517_v45 = vpop.f32.mrf.mxu1 }
 0x15c   : > { %v1544_v53 = vpop.permute.xlu0 %1543  ;;  %1366 = vmatprep.mubr.bf16.mxu0 %v2718_v12 }
 0x15d   : > { %v1546_v54 = vpop.permute.xlu1 %1545  ;;  %v519_v49 = vpop.f32.mrf.mxu1 }
 0x15e   : > { %2154 = vrot.lane.b32.xlu0 %v2702_v46, %s2732_s13  ;;  %v1555_v56 = vsel %vm1547_vm10, %v1544_v53, %v1546_v54  ;;  %2555 = vmatmul.mubr.msk.bf16.vlgmr.msra.gmra.mxu1 %vm355_vm0, %v2682_v52  ;;  %v396_v25 = vpop.f32.mrf.mxu0 }
 0x15f   : > { %2150 = vrot.lane.b32.xlu1 %v2703_v51, %s2732_s13  ;;  %1578 = vmatprep.subr.bf16.mxu0 %v1555_v56  ;;  %v506_v26 = vadd.f32 %v505_v8, %v396_v25  ;;  %v521_v56 = vpop.f32.mrf.mxu1  ;;  %v2688_v25 = vld [vmem:[%s2774_s21 + $0xb8] sm:$0xff]  }
 0x160   : > { %v1542_v57 = vpop.permute.xlu0 %1541  ;;  %1489 = vmatprep.mubr.bf16.mxu1 %v2718_v12  ;;  %v398_v9 = vpop.f32.mrf.mxu0 }
 0x161   : > { %v1554_v58 = vsel %vm1547_vm10, %v1542_v57, %v1544_v53  ;;  %v1667_v59 = vpop.permute.xlu1 %1666  ;;  %2548 = vmatmul.mubr.msk.bf16.gmra.mxu0 %vm355_vm0, %v2683_v55  ;;  %v508_v31 = vadd.f32 %v507_v30, %v398_v9  ;;  %v2685_v55 = vld [vmem:[%s2774_s21 + $0xa0] sm:$0xff]  }
 0x162   : > { %2023 = vrot.lane.b32.xlu0 %v2704_v0, %s2731_s12  ;;  %1579 = vmatpush1.bf16.msra.mxu0 %v1554_v58 }
 0x163   : > { %2025 = vrot.lane.b32.xlu1 %v2705_v2, %s2731_s12  ;;  %1602 = vmatprep.mubr.bf16.mxu0 %v2718_v12 }
 0x164   : > { %v1669_v60 = vpop.permute.xlu0 %1668 }
 0x165   : > { %v1665_v61 = vpop.permute.xlu1 %1664  ;;  %v1678_v62 = vsel %vm1670_vm11, %v1667_v59, %v1669_v60 }
 0x166   : > { %v1677_v63 = vsel %vm1670_vm11, %v1665_v61, %v1667_v59  ;;  %2021 = vrot.lane.b32.xlu0 %v2706_v13, %s2731_s12  ;;  %1701 = vmatprep.subr.bf16.mxu1 %v1678_v62 }
 0x167   : > { %2146 = vrot.lane.b32.xlu1 %v2704_v0, %s2732_s13  ;;  %1702 = vmatpush1.bf16.msra.mxu1 %v1677_v63 }
 0x168   : > { %v1538_v14 = vpop.permute.xlu0 %1537  ;;  %2556 = vmatmul.mubr.msk.bf16.gmra.mxu1 %vm355_vm0, %v2684_v1  ;;  %v2686_v1 = vld [vmem:[%s2774_s21 + $0xb0] sm:$0xff]  }
 0x169   : > { %v1540_v3 = vpop.permute.xlu1 %1539  ;;  %1725 = vmatprep.mubr.bf16.mxu1 %v2718_v12 }
 0x16a   : > { %2148 = vrot.lane.b32.xlu0 %v2705_v2, %s2732_s13  ;;  %v1553_v15 = vsel %vm1547_vm10, %v1538_v14, %v1540_v3  ;;  %v2687_v3 = vld [vmem:[%s2774_s21 + $0xa8] sm:$0xff]  }
 0x16b   : > { %2144 = vrot.lane.b32.xlu1 %v2706_v13, %s2732_s13  ;;  %1580 = vmatprep.subr.bf16.mxu0 %v1553_v15 }
 0x16c   : > { %v1536_v16 = vpop.permute.xlu0 %1535 }
 0x16d   : > { %v1552_v4 = vsel %vm1547_vm10, %v1536_v16, %v1538_v14  ;;  %v1661_v5 = vpop.permute.xlu1 %1660 }
 0x16e   : > { %2017 = vrot.lane.b32.xlu0 %v3200_v7, %s2731_s12  ;;  %1581 = vmatpush1.bf16.msra.mxu0 %v1552_v4 }
 0x16f   : > { %2019 = vrot.lane.b32.xlu1 %v2707_v17, %s2731_s12 }
 0x170   : > { %v1663_v18 = vpop.permute.xlu0 %1662 }
 0x171   : > { %v1659_v19 = vpop.permute.xlu1 %1658  ;;  %v1676_v20 = vsel %vm1670_vm11, %v1661_v5, %v1663_v18 }
 0x172   : > { %v1675_v21 = vsel %vm1670_vm11, %v1659_v19, %v1661_v5  ;;  %2015 = vrot.lane.b32.xlu0 %v2708_v22, %s2731_s12  ;;  %1703 = vmatprep.subr.bf16.mxu1 %v1676_v20 }
 0x173   : > { %2140 = vrot.lane.b32.xlu1 %v3200_v7, %s2732_s13  ;;  %1704 = vmatpush1.bf16.msra.mxu1 %v1675_v21  ;;  %v400_v7 = vpop.f32.mrf.mxu0 }
 0x174   : > { %v1532_v23 = vpop.permute.xlu0 %1531  ;;  %v510_v11 = vadd.f32 %v509_v32, %v400_v7 }
 0x175   : > { %v1534_v6 = vpop.permute.xlu1 %1533  ;;  %v402_v34 = vpop.f32.mrf.mxu0 }
 0x176   : > { %2142 = vrot.lane.b32.xlu0 %v2707_v17, %s2732_s13  ;;  %v1551_v24 = vsel %vm1547_vm10, %v1532_v23, %v1534_v6  ;;  %v512_v39 = vadd.f32 %v511_v37, %v402_v34 }
 0x177   : > { %2138 = vrot.lane.b32.xlu1 %v2708_v22, %s2732_s13  ;;  %1582 = vmatprep.subr.bf16.mxu0 %v1551_v24  ;;  %v406_v38 = vpop.f32.mrf.mxu0 }
 0x178   : > { %v1530_v27 = vpop.permute.xlu0 %1529  ;;  %v516_v43 = vadd.f32 %v515_v40, %v406_v38 }
 0x179   : > { %v1550_v28 = vsel %vm1547_vm10, %v1530_v27, %v1532_v23  ;;  %v1655_v29 = vpop.permute.xlu1 %1654  ;;  %v408_v42 = vpop.f32.mrf.mxu0 }
 0x17a   : > { %1583 = vmatpush1.bf16.msra.mxu0 %v1550_v28  ;;  %v518_v48 = vadd.f32 %v517_v45, %v408_v42 }
 0x17b   : > { %v410_v47 = vpop.f32.mrf.mxu0 }
 0x17c   : > { %v1657_v33 = vpop.permute.xlu0 %1656  ;;  %v520_v52 = vadd.f32 %v519_v49, %v410_v47 }
 0x17d   : > { %v1653_v35 = vpop.permute.xlu1 %1652  ;;  %v1674_v36 = vsel %vm1670_vm11, %v1655_v29, %v1657_v33  ;;  %v412_v51 = vpop.f32.mrf.mxu0 }
 0x17e   : > { %v1673_v10 = vsel %vm1670_vm11, %v1653_v35, %v1655_v29  ;;  %1705 = vmatprep.subr.bf16.mxu1 %v1674_v36  ;;  %v522_v57 = vadd.f32 %v521_v56, %v412_v51 }
 0x17f   : > { %1706 = vmatpush1.bf16.msra.mxu1 %v1673_v10 }
 0x180   : > { %v1526_v41 = vpop.permute.xlu0 %1525 }
 0x181   : > { %v1528_v44 = vpop.permute.xlu1 %1527 }
 0x182   : > { %v1549_v46 = vsel %vm1547_vm10, %v1526_v41, %v1528_v44 }
 0x183   : > { %1584 = vmatprep.subr.bf16.mxu0 %v1549_v46 }
 0x184   : > { %v1524_v50 = vpop.permute.xlu0 %1523 }
 0x185   : > { %v1548_v53 = vsel %vm1547_vm10, %v1524_v50, %v1526_v41  ;;  %v1649_v54 = vpop.permute.xlu1 %1648 }
 0x186   : > { %1585 = vmatpush1.bf16.msra.mxu0 %v1548_v53 }
 0x188   : > { %v1651_v58 = vpop.permute.xlu0 %1650 }
 0x189   : > { %v1647_v59 = vpop.permute.xlu1 %1646  ;;  %2563 = vmatmul.mubr.msk.bf16.vlgmr.msra.gmra.mxu0 %vm355_vm0, %v2685_v55  ;;  %v1672_v0 = vsel %vm1670_vm11, %v1649_v54, %v1651_v58  ;;  %v620_v2 = vpop.f32.mrf.mxu0 }
 0x18a   : > { %v1671_v60 = vsel %vm1670_vm11, %v1647_v59, %v1649_v54  ;;  %1707 = vmatprep.subr.bf16.mxu1 %v1672_v0  ;;  %1612 = vmatprep.mubr.bf16.mxu0 %v2718_v12  ;;  %v639_v61 = vadd.f32 %v620_v2, %v506_v26 }
 0x18b   : > { %1708 = vmatpush1.bf16.msra.mxu1 %v1671_v60  ;;  %v622_v62 = vpop.f32.mrf.mxu0 }
 0x18c   : > { %v1790_v63 = vpop.permute.xlu0 %1789  ;;  %v640_v13 = vadd.f32 %v622_v62, %v508_v31 }
 0x18d   : > { %v1792_v14 = vpop.permute.xlu1 %1791  ;;  %v624_v15 = vpop.f32.mrf.mxu0 }
 0x18e   : > { %2571 = vmatmul.mubr.msk.bf16.vlgmr.msra.gmra.mxu1 %vm355_vm0, %v2686_v1  ;;  %v1801_v16 = vsel %vm1793_vm12, %v1790_v63, %v1792_v14  ;;  %v641_v4 = vadd.f32 %v624_v15, %v510_v11  ;;  %v743_v5 = vpop.f32.mrf.mxu1  ;;  %v2689_v15 = vld [vmem:[%s2774_s21 + $0xc0] sm:$0xff]  }
 0x18f   : > { %1824 = vmatprep.subr.bf16.mxu0 %v1801_v16  ;;  %1735 = vmatprep.mubr.bf16.mxu1 %v2718_v12  ;;  %v3289_v17 = vadd.f32 %v743_v5, %v639_v61  ;;  %v626_v18 = vpop.f32.mrf.mxu0 }
 0x190   : > { %v1788_v19 = vpop.permute.xlu0 %1787  ;;  %v642_v20 = vadd.f32 %v626_v18, %v512_v39  ;;  %v745_v21 = vpop.f32.mrf.mxu1 }
 0x191   : > { %v1800_v22 = vsel %vm1793_vm12, %v1788_v19, %v1790_v63  ;;  %v1913_v23 = vpop.permute.xlu1 %1912  ;;  %2564 = vmatmul.mubr.msk.bf16.gmra.mxu0 %vm355_vm0, %v2687_v3  ;;  %v3293_v6 = vadd.f32 %v745_v21, %v640_v13  ;;  %v630_v24 = vpop.f32.mrf.mxu0 }
 0x192   : > { %1825 = vmatpush1.bf16.msra.mxu0 %v1800_v22  ;;  %1848 = vmatprep.mubr.bf16.mxu0 %v2718_v12  ;;  %v643_v8 = vadd.f32 %v630_v24, %v516_v43  ;;  %v747_v26 = vpop.f32.mrf.mxu1 }
 0x193   : > { %v3297_v27 = vadd.f32 %v747_v26, %v641_v4  ;;  %v632_v9 = vpop.f32.mrf.mxu0 }
 0x194   : > { %v1915_v28 = vpop.permute.xlu0 %1914  ;;  %v644_v29 = vadd.f32 %v632_v9, %v518_v48  ;;  %v749_v30 = vpop.f32.mrf.mxu1 }
 0x195   : > { %v1911_v7 = vpop.permute.xlu1 %1910  ;;  %v1924_v31 = vsel %vm1916_vm13, %v1913_v23, %v1915_v28  ;;  %v3300_v32 = vadd.f32 %v749_v30, %v642_v20  ;;  %v634_v33 = vpop.f32.mrf.mxu0  ;;  %v2690_v20 = vld [vmem:[%s2774_s21 + $0xd0] sm:$0xff]  }
 0x196   : > { %v1923_v34 = vsel %vm1916_vm13, %v1911_v7, %v1913_v23  ;;  %2572 = vmatmul.mubr.msk.bf16.gmra.mxu1 %vm355_vm0, %v2688_v25  ;;  %1947 = vmatprep.subr.bf16.mxu1 %v1924_v31  ;;  %v645_v11 = vadd.f32 %v634_v33, %v520_v52 }
 0x197   : > { %1948 = vmatpush1.bf16.msra.mxu1 %v1923_v34  ;;  %1971 = vmatprep.mubr.bf16.mxu1 %v2718_v12  ;;  %v636_v35 = vpop.f32.mrf.mxu0 }
 0x198   : > { %v1784_v36 = vpop.permute.xlu0 %1783  ;;  %v753_v37 = vpop.f32.mrf.mxu1  ;;  %v646_v10 = vadd.f32 %v636_v35, %v522_v57  ;;  %v2692_v35 = vld [vmem:[%s2774_s21 + $0xd8] sm:$0xff]  }
 0x199   : > { %v1786_v38 = vpop.permute.xlu1 %1785  ;;  %v3305_v39 = vadd.f32 %v753_v37, %v643_v8  ;;  %v2691_v8 = vld [vmem:[%s2774_s21 + $0xc8] sm:$0xff]  }
 0x19a   : > { %v1799_v40 = vsel %vm1793_vm12, %v1784_v36, %v1786_v38  ;;  %v755_v41 = vpop.f32.mrf.mxu1 }
 0x19b   : > { %1826 = vmatprep.subr.bf16.mxu0 %v1799_v40  ;;  %v3308_v42 = vadd.f32 %v755_v41, %v644_v29 }
 0x19c   : > { %v1782_v43 = vpop.permute.xlu0 %1781  ;;  %v757_v44 = vpop.f32.mrf.mxu1 }
 0x19d   : > { %v1798_v45 = vsel %vm1793_vm12, %v1782_v43, %v1784_v36  ;;  %v1907_v46 = vpop.permute.xlu1 %1906  ;;  %v3311_v47 = vadd.f32 %v757_v44, %v645_v11 }
 0x19e   : > { %1827 = vmatpush1.bf16.msra.mxu0 %v1798_v45  ;;  %v759_v48 = vpop.f32.mrf.mxu1 }
 0x19f   : > { %v3313_v49 = vadd.f32 %v759_v48, %v646_v10 }
 0x1a0   : > { %v1909_v50 = vpop.permute.xlu0 %1908 }
 0x1a1   : > { %v1905_v51 = vpop.permute.xlu1 %1904  ;;  %v1922_v52 = vsel %vm1916_vm13, %v1907_v46, %v1909_v50 }
 0x1a2   : > { %v1921_v53 = vsel %vm1916_vm13, %v1905_v51, %v1907_v46  ;;  %1949 = vmatprep.subr.bf16.mxu1 %v1922_v52 }
 0x1a3   : > { %1950 = vmatpush1.bf16.msra.mxu1 %v1921_v53 }
 0x1a4   : > { %v1778_v54 = vpop.permute.xlu0 %1777 }
 0x1a5   : > { %v1780_v55 = vpop.permute.xlu1 %1779 }
 0x1a6   : > { %v1797_v56 = vsel %vm1793_vm12, %v1778_v54, %v1780_v55 }
 0x1a7   : > { %1828 = vmatprep.subr.bf16.mxu0 %v1797_v56 }
 0x1a8   : > { %v1776_v57 = vpop.permute.xlu0 %1775 }
 0x1a9   : > { %v1796_v58 = vsel %vm1793_vm12, %v1776_v57, %v1778_v54  ;;  %v1901_v59 = vpop.permute.xlu1 %1900 }
 0x1aa   : > { %1829 = vmatpush1.bf16.msra.mxu0 %v1796_v58 }
 0x1ac   : > { %v1903_v0 = vpop.permute.xlu0 %1902 }
 0x1ad   : > { %v1899_v2 = vpop.permute.xlu1 %1898  ;;  %v1920_v60 = vsel %vm1916_vm13, %v1901_v59, %v1903_v0 }
 0x1ae   : > { %v1919_v1 = vsel %vm1916_vm13, %v1899_v2, %v1901_v59  ;;  %1951 = vmatprep.subr.bf16.mxu1 %v1920_v60 }
 0x1af   : > { %1952 = vmatpush1.bf16.msra.mxu1 %v1919_v1 }
 0x1b0   : > { %v1772_v61 = vpop.permute.xlu0 %1771 }
 0x1b1   : > { %v1774_v62 = vpop.permute.xlu1 %1773 }
 0x1b2   : > { %v1795_v63 = vsel %vm1793_vm12, %v1772_v61, %v1774_v62 }
 0x1b3   : > { %1830 = vmatprep.subr.bf16.mxu0 %v1795_v63 }
 0x1b4   : > { %v1770_v13 = vpop.permute.xlu0 %1769 }
 0x1b5   : > { %v1794_v14 = vsel %vm1793_vm12, %v1770_v13, %v1772_v61  ;;  %v1895_v3 = vpop.permute.xlu1 %1894 }
 0x1b6   : > { %1831 = vmatpush1.bf16.msra.mxu0 %v1794_v14 }
 0x1b8   : > { %v1897_v16 = vpop.permute.xlu0 %1896 }
 0x1b9   : > { %v1893_v4 = vpop.permute.xlu1 %1892  ;;  %2579 = vmatmul.mubr.msk.bf16.vlgmr.msra.gmra.mxu0 %vm355_vm0, %v2689_v15  ;;  %v1918_v5 = vsel %vm1916_vm13, %v1895_v3, %v1897_v16  ;;  %v866_v18 = vpop.f32.mrf.mxu0 }
 0x1ba   : > { %v1917_v19 = vsel %vm1916_vm13, %v1893_v4, %v1895_v3  ;;  %1953 = vmatprep.subr.bf16.mxu1 %v1918_v5  ;;  %1858 = vmatprep.mubr.bf16.mxu0 %v2718_v12  ;;  %v885_v21 = vadd.f32 %v866_v18, %v3289_v17 }
 0x1bb   : > { %1954 = vmatpush1.bf16.msra.mxu1 %v1917_v19  ;;  %v868_v22 = vpop.f32.mrf.mxu0 }
 0x1bc   : > { %v2036_v23 = vpop.permute.xlu0 %2035  ;;  %v886_v24 = vadd.f32 %v868_v22, %v3293_v6  ;;  %v2693_v22 = vld [vmem:[%s2774_s21 + $0xe0] sm:$0xff]  }
 0x1bd   : > { %v2038_v25 = vpop.permute.xlu1 %2037  ;;  %v870_v26 = vpop.f32.mrf.mxu0 }
 0x1be   : > { %2587 = vmatmul.mubr.msk.bf16.vlgmr.msra.gmra.mxu1 %vm355_vm0, %v2690_v20  ;;  %v2047_v9 = vsel %vm2039_vm14, %v2036_v23, %v2038_v25  ;;  %v887_v28 = vadd.f32 %v870_v26, %v3297_v27  ;;  %v989_v29 = vpop.f32.mrf.mxu1 }
 0x1bf   : > { %2070 = vmatprep.subr.bf16.mxu0 %v2047_v9  ;;  %1981 = vmatprep.mubr.bf16.mxu1 %v2718_v12  ;;  %v3336_v17 = vadd.f32 %v989_v29, %v885_v21  ;;  %v872_v30 = vpop.f32.mrf.mxu0  ;;  %v2694_v29 = vld [vmem:[%s2774_s21 + $0xf0] sm:$0xff]  }
 0x1c0   : > { %v2034_v7 = vpop.permute.xlu0 %2033  ;;  %v888_v6 = vadd.f32 %v872_v30, %v3300_v32  ;;  %v991_v31 = vpop.f32.mrf.mxu1 }
 0x1c1   : > { %v2046_v33 = vsel %vm2039_vm14, %v2034_v7, %v2036_v23  ;;  %v2159_v34 = vpop.permute.xlu1 %2158  ;;  %2580 = vmatmul.mubr.msk.bf16.gmra.mxu0 %vm355_vm0, %v2691_v8  ;;  %v3341_v11 = vadd.f32 %v991_v31, %v886_v24  ;;  %v876_v27 = vpop.f32.mrf.mxu0 }
 0x1c2   : > { %2071 = vmatpush1.bf16.msra.mxu0 %v2046_v33  ;;  %2094 = vmatprep.mubr.bf16.mxu0 %v2718_v12  ;;  %v889_v36 = vadd.f32 %v876_v27, %v3305_v39  ;;  %v993_v37 = vpop.f32.mrf.mxu1  ;;  %v2695_v33 = vld [vmem:[%s2774_s21 + $0xe8] sm:$0xff]  }
 0x1c3   : > { %v3346_v10 = vadd.f32 %v993_v37, %v887_v28  ;;  %v878_v32 = vpop.f32.mrf.mxu0 }
 0x1c4   : > { %v2161_v38 = vpop.permute.xlu0 %2160  ;;  %v890_v40 = vadd.f32 %v878_v32, %v3308_v42  ;;  %v995_v41 = vpop.f32.mrf.mxu1 }
 0x1c5   : > { %v2157_v43 = vpop.permute.xlu1 %2156  ;;  %v2170_v44 = vsel %vm2162_vm15, %v2159_v34, %v2161_v38  ;;  %v3350_v45 = vadd.f32 %v995_v41, %v888_v6  ;;  %v3367_v5 = vpop.f32.mrf.mxu0 }
 0x1c6   : > { %v2169_v46 = vsel %vm2162_vm15, %v2157_v43, %v2159_v34  ;;  %2588 = vmatmul.mubr.msk.bf16.gmra.mxu1 %vm355_vm0, %v2692_v35  ;;  %2193 = vmatprep.subr.bf16.mxu1 %v2170_v44 }
 0x1c7   : > { %2194 = vmatpush1.bf16.msra.mxu1 %v2169_v46  ;;  %2217 = vmatprep.mubr.bf16.mxu1 %v2718_v12  ;;  %v3372_v23 = vpop.f32.mrf.mxu0  ;;  %v3600_v46 = vmov 0.0  }
 0x1c8   : > { %v2030_v39 = vpop.permute.xlu0 %2029  ;;  %v999_v48 = vpop.f32.mrf.mxu1 }
 0x1c9   : > { %v2032_v50 = vpop.permute.xlu1 %2031  ;;  %v3355_v51 = vadd.f32 %v999_v48, %v889_v36 }
 0x1ca   : > { %v2045_v42 = vsel %vm2039_vm14, %v2030_v39, %v2032_v50  ;;  %v1001_v52 = vpop.f32.mrf.mxu1  ;;  %v2251_v50 = vld [vmem:[%s3598_s3 + $0x8] sm:$0xff] }
 0x1cb   : > { %2072 = vmatprep.subr.bf16.mxu0 %v2045_v42  ;;  %v3358_v53 = vadd.f32 %v1001_v52, %v890_v40  ;;  %v2250_v42 = vld [vmem:[%s3598_s3] sm:$0xff]  ;;  %2261 = vperm.xlu1 %2648, %v2251_v50  }
 0x1cc   : > { %v2028_v54 = vpop.permute.xlu0 %2027  ;;  %v3374_v24 = vpop.f32.mrf.mxu1  ;;  %2256 = vperm.xlu0 %2647, %v2250_v42  }
 0x1cd   : > { %v2044_v55 = vsel %vm2039_vm14, %v2028_v54, %v2030_v39  ;;  %v2153_v56 = vpop.permute.xlu1 %2152  ;;  %v2252_v54 = vld [vmem:[%s3598_s3 + $0x10] sm:$0xff] }
 0x1ce   : > { %2073 = vmatpush1.bf16.msra.mxu0 %v2044_v55  ;;  %v3382_v7 = vpop.f32.mrf.mxu1  ;;  %v2253_v55 = vld [vmem:[%s3598_s3 + $0x18] sm:$0xff] }
 0x1cf   : > { %2266 = vperm.xlu1 %2648, %v2252_v54  }
 0x1d0   : > { %v2155_v57 = vpop.permute.xlu0 %2154  ;;  %2271 = vperm.xlu0 %2647, %v2253_v55  }
 0x1d1   : > { %v2151_v58 = vpop.permute.xlu1 %2150  ;;  %v2168_v59 = vsel %vm2162_vm15, %v2153_v56, %v2155_v57 }
 0x1d2   : > { %v2167_v0 = vsel %vm2162_vm15, %v2151_v58, %v2153_v56  ;;  %2195 = vmatprep.subr.bf16.mxu1 %v2168_v59 }
 0x1d3   : > { %2196 = vmatpush1.bf16.msra.mxu1 %v2167_v0 }
 0x1d4   : > { %v2024_v2 = vpop.permute.xlu0 %2023 }
 0x1d5   : > { %v2026_v60 = vpop.permute.xlu1 %2025 }
 0x1d6   : > { %v2043_v1 = vsel %vm2039_vm14, %v2024_v2, %v2026_v60 }
 0x1d7   : > { %2074 = vmatprep.subr.bf16.mxu0 %v2043_v1 }
 0x1d8   : > { %v2022_v61 = vpop.permute.xlu0 %2021 }
 0x1d9   : > { %v2042_v62 = vsel %vm2039_vm14, %v2022_v61, %v2024_v2  ;;  %v2147_v63 = vpop.permute.xlu1 %2146 }
 0x1da   : > { %2075 = vmatpush1.bf16.msra.mxu0 %v2042_v62 }
 0x1dc   : > { %v2149_v13 = vpop.permute.xlu0 %2148 }
 0x1dd   : > { %v2145_v14 = vpop.permute.xlu1 %2144  ;;  %v2166_v3 = vsel %vm2162_vm15, %v2147_v63, %v2149_v13 }
 0x1de   : > { %v2165_v15 = vsel %vm2162_vm15, %v2145_v14, %v2147_v63  ;;  %2197 = vmatprep.subr.bf16.mxu1 %v2166_v3 }
 0x1df   : > { %2198 = vmatpush1.bf16.msra.mxu1 %v2165_v15 }
 0x1e0   : > { %v2018_v16 = vpop.permute.xlu0 %2017 }
 0x1e1   : > { %v2020_v4 = vpop.permute.xlu1 %2019 }
 0x1e2   : > { %v2041_v18 = vsel %vm2039_vm14, %v2018_v16, %v2020_v4 }
 0x1e3   : > { %2076 = vmatprep.subr.bf16.mxu0 %v2041_v18 }
 0x1e4   : > { %v2016_v19 = vpop.permute.xlu0 %2015 }
 0x1e5   : > { %v2040_v20 = vsel %vm2039_vm14, %v2016_v19, %v2018_v16  ;;  %v2141_v21 = vpop.permute.xlu1 %2140 }
 0x1e6   : > { %2077 = vmatpush1.bf16.msra.mxu0 %v2040_v20 }
 0x1e8   : > { %v2143_v25 = vpop.permute.xlu0 %2142 }
 0x1e9   : > { %v2139_v8 = vpop.permute.xlu1 %2138  ;;  %2595 = vmatmul.mubr.msk.bf16.vlgmr.msra.gmra.mxu0 %vm355_vm0, %v2693_v22  ;;  %v2164_v26 = vsel %vm2162_vm15, %v2141_v21, %v2143_v25  ;;  %v1112_v9 = vpop.f32.mrf.mxu0 }
 0x1ea   : > { %v2163_v28 = vsel %vm2162_vm15, %v2139_v8, %v2141_v21  ;;  %2199 = vmatprep.subr.bf16.mxu1 %v2164_v26  ;;  %2104 = vmatprep.mubr.bf16.mxu0 %v2718_v12  ;;  %v1131_v30 = vadd.f32 %v1112_v9, %v3336_v17  ;;  %v2696_v17 = vld [vmem:[%s2774_s21 + $0xf8] sm:$0xff]  }
 0x1eb   : > { %2200 = vmatpush1.bf16.msra.mxu1 %v2163_v28  ;;  %v1114_v6 = vpop.f32.mrf.mxu0 }
 0x1ec   : > { %v1132_v31 = vadd.f32 %v1114_v6, %v3341_v11 }
 0x1ed   : > { %v3395_v37 = vpop.f32.mrf.mxu0 }
 0x1ee   : > { %2603 = vmatmul.mubr.msk.bf16.vlgmr.msra.gmra.mxu1 %vm355_vm0, %v2694_v29  ;;  %v1235_v34 = vpop.f32.mrf.mxu1 }
 0x1ef   : > { %2227 = vmatprep.mubr.bf16.mxu1 %v2718_v12  ;;  %v3388_v27 = vadd.f32 %v1235_v34, %v1131_v30  ;;  %v3397_v32 = vpop.f32.mrf.mxu0 }
 0x1f0   : > { %v1237_v35 = vpop.f32.mrf.mxu1 }
 0x1f1   : > { %2596 = vmatmul.mubr.msk.bf16.gmra.mxu0 %vm355_vm0, %v2695_v33  ;;  %v3391_v36 = vadd.f32 %v1237_v35, %v1132_v31  ;;  %v3401_v38 = vpop.f32.mrf.mxu0 }
 0x1f2   : > { %v3399_v11 = vpop.f32.mrf.mxu1  ;;  %2351 = vmatprep.mubr.f32.mxu0 %v3600_v46 }
 0x1f3   : > { %v3405_v12 = vpop.f32.mrf.mxu0 }
 0x1f4   : > { %v3403_v40 = vpop.f32.mrf.mxu1 }
 0x1f5   : > { %v3409_v43 = vpop.f32.mrf.mxu0 }
 0x1f6   : > { %2604 = vmatmul.mubr.msk.bf16.gmra.mxu1 %vm355_vm0, %v2696_v17  ;;  %vm2274_vm0 = vcmask 261120  }
 0x1f7   : > { %2363 = vmatprep.mubr.f32.mxu1 %v3600_v46  ;;  %v1128_v39 = vpop.f32.mrf.mxu0  ;;  %v892_v46 = vadd.f32 %v3372_v23, %v3313_v49  ;;  %v1135_v23 = vadd.f32 %v3401_v38, %v3355_v51 }
 0x1f8   : > { %v3407_v41 = vpop.f32.mrf.mxu1 }
 0x1fa   : > { %v3411_v44 = vpop.f32.mrf.mxu1 }
 0x1fc   : > { %v3415_v48 = vpop.f32.mrf.mxu1 }
 0x1fe   : > { %v1251_v56 = vpop.f32.mrf.mxu1 }
 0x219   : > { %v3423_v52 = vpop.f32.mrf.mxu0 }
 0x21b   : > { %v3431_v57 = vpop.f32.mrf.mxu0 }
 0x21d   : > { %v3435_v59 = vpop.f32.mrf.mxu0 }
 0x21e   : > { %v3433_v58 = vpop.f32.mrf.mxu1 }
 0x21f   : > { %v3439_v2 = vpop.f32.mrf.mxu0 }
 0x220   : > { %v3437_v0 = vpop.f32.mrf.mxu1 }
 0x221   : > { %v1368_v1 = vpop.f32.mrf.mxu0 }
 0x222   : > { %v3441_v60 = vpop.f32.mrf.mxu1 }
 0x223   : > { %v1370_v62 = vpop.f32.mrf.mxu0 }
 0x224   : > { %v3443_v61 = vpop.f32.mrf.mxu1 }
 0x225   : > { %v1372_v13 = vpop.f32.mrf.mxu0 }
 0x227   : > { %v1374_v3 = vpop.f32.mrf.mxu0 }
 0x228   : > { %v3445_v63 = vpop.f32.mrf.mxu1 }
 0x22a   : > { %v1493_v14 = vpop.f32.mrf.mxu1 }
 0x22c   : > { %v3447_v15 = vpop.f32.mrf.mxu1 }
 0x22e   : > { %v1497_v4 = vpop.f32.mrf.mxu1 }
 0x249   : > { %v3449_v16 = vpop.f32.mrf.mxu0 }
 0x24b   : > { %v3451_v18 = vpop.f32.mrf.mxu0 }
 0x24d   : > { %v3455_v20 = vpop.f32.mrf.mxu0 }
 0x24e   : > { %v3453_v19 = vpop.f32.mrf.mxu1 }
 0x24f   : > { %3602 = vst [vmem:[#allocation2_spill] sm:$0xff] %v3453_v19  ;;  %v3459_v22 = vpop.f32.mrf.mxu0 }
 0x250   : > { %v3457_v21 = vpop.f32.mrf.mxu1 }
 0x251   : > { %3603 = vst [vmem:[#allocation3_spill] sm:$0xff] %v3457_v21  ;;  %v3463_v8 = vpop.f32.mrf.mxu0 }
 0x252   : > { %v3461_v25 = vpop.f32.mrf.mxu1 }
 0x253   : > { %v1616_v9 = vpop.f32.mrf.mxu0 }
 0x254   : > { %v3465_v26 = vpop.f32.mrf.mxu1 }
 0x255   : > { %v3469_v29 = vpop.f32.mrf.mxu0 }
 0x256   : > { %v3467_v28 = vpop.f32.mrf.mxu1 }
 0x257   : > { %v1620_v6 = vpop.f32.mrf.mxu0 }
 0x258   : > { %v3471_v30 = vpop.f32.mrf.mxu1 }
 0x25a   : > { %v3473_v31 = vpop.f32.mrf.mxu1 }
 0x25c   : > { %v1743_v34 = vpop.f32.mrf.mxu1 }
 0x279   : > { %v3475_v33 = vpop.f32.mrf.mxu0 }
 0x27a   : > { %3604 = vst [vmem:[#allocation4_spill] sm:$0xff] %v3475_v33  ;;  %v891_v33 = vadd.f32 %v3367_v5, %v3311_v47 }
 0x27b   : > { %v3477_v35 = vpop.f32.mrf.mxu0 }
 0x27c   : > { %3605 = vst [vmem:[#allocation5_spill] sm:$0xff] %v3477_v35 }
 0x27d   : > { %v3481_v50 = vpop.f32.mrf.mxu0 }
 0x27e   : > { %v3479_v17 = vpop.f32.mrf.mxu1  ;;  %3607 = vst [vmem:[#allocation7_spill] sm:$0xff] %v3481_v50 }
 0x27f   : > { %3606 = vst [vmem:[#allocation6_spill] sm:$0xff] %v3479_v17  ;;  %v3485_v54 = vpop.f32.mrf.mxu0  ;;  %v1015_v17 = vadd.f32 %v3382_v7, %v892_v46  ;;  %v1134_v7 = vadd.f32 %v3397_v32, %v3350_v45 }
 0x280   : > { %v3483_v42 = vpop.f32.mrf.mxu1  ;;  %3609 = vst [vmem:[#allocation9_spill] sm:$0xff] %v3485_v54 }
 0x281   : > { %3608 = vst [vmem:[#allocation8_spill] sm:$0xff] %v3483_v42  ;;  %v3491_v19 = vpop.f32.mrf.mxu0  ;;  %v1014_v42 = vadd.f32 %v3374_v24, %v891_v33  ;;  %v1138_v54 = vadd.f32 %v1128_v39, %v1015_v17  ;;  %v1257_v38 = vadd.f32 %v3403_v40, %v1134_v7 }
 0x282   : > { %v3487_v55 = vpop.f32.mrf.mxu1 }
 0x283   : > { %3610 = vst [vmem:[#allocation10_spill] sm:$0xff] %v3487_v55  ;;  %v3498_v35 = vpop.f32.mrf.mxu0  ;;  %v1136_v55 = vadd.f32 %v3405_v12, %v3358_v53  ;;  %v1137_v47 = vadd.f32 %v3409_v43, %v1014_v42  ;;  %v1261_v24 = vadd.f32 %v1251_v56, %v1138_v54  ;;  %v1258_v53 = vadd.f32 %v3407_v41, %v1135_v23 }
 0x284   : > { %v3495_v21 = vpop.f32.mrf.mxu1  ;;  %v1380_v41 = vadd.f32 %v3439_v2, %v1257_v38 }
 0x285   : > { %3611 = vst [vmem:[#allocation11_spill] sm:$0xff] %v3495_v21  ;;  %v1864_v49 = vpop.f32.mrf.mxu0  ;;  %v1259_v46 = vadd.f32 %v3411_v44, %v1136_v55  ;;  %v1133_v21 = vadd.f32 %v3395_v37, %v3346_v10  ;;  %v1260_v12 = vadd.f32 %v3415_v48, %v1137_v47  ;;  %v1384_v17 = vadd.f32 %v1374_v3, %v1261_v24 }
 0x286   : > { %v3501_v50 = vpop.f32.mrf.mxu1  ;;  %v1381_v32 = vadd.f32 %v1368_v1, %v1258_v53  ;;  %v1378_v37 = vadd.f32 %v3431_v57, %v3391_v36  ;;  %v1377_v3 = vadd.f32 %v3423_v52, %v3388_v27  ;;  %v1503_v57 = vadd.f32 %v3443_v61, %v1380_v41 }
 0x287   : > { %v1866_v33 = vpop.f32.mrf.mxu0  ;;  %v1382_v43 = vadd.f32 %v1370_v62, %v1259_v46  ;;  %v1256_v45 = vadd.f32 %v3399_v11, %v1133_v21  ;;  %v1383_v44 = vadd.f32 %v1372_v13, %v1260_v12  ;;  %v1507_v40 = vadd.f32 %v1497_v4, %v1384_v17  ;;  %v3613_v17 = vld [vmem:[#allocation9_spill] sm:$0xff] }
 0x288   : > { %v3508_v5 = vpop.f32.mrf.mxu1  ;;  %v1504_v1 = vadd.f32 %v3445_v63, %v1381_v32  ;;  %v1501_v36 = vadd.f32 %v3437_v0, %v1378_v37  ;;  %v1500_v27 = vadd.f32 %v3433_v58, %v1377_v3  ;;  %v1626_v61 = vadd.f32 %v3459_v22, %v1503_v57  ;;  %v3618_v3 = vld [vmem:[#allocation4_spill] sm:$0xff] }
 0x289   : > { %v1505_v48 = vadd.f32 %v1493_v14, %v1382_v43  ;;  %v1379_v11 = vadd.f32 %v3435_v59, %v1256_v45  ;;  %v1506_v13 = vadd.f32 %v3447_v15, %v1383_v44  ;;  %v1630_v14 = vadd.f32 %v1620_v6, %v1507_v40  ;;  %v3612_v43 = vld [vmem:[#allocation3_spill] sm:$0xff]  ;;  %v3614_v45 = vld [vmem:[#allocation2_spill] sm:$0xff]  ;;  %v3620_v57 = vld [vmem:[#allocation8_spill] sm:$0xff] }
 0x28a   : > { %v1987_v39 = vpop.f32.mrf.mxu1  ;;  %v1627_v59 = vadd.f32 %v3463_v8, %v1504_v1  ;;  %v1624_v0 = vadd.f32 %v3451_v18, %v1501_v36  ;;  %v1623_v58 = vadd.f32 %v3449_v16, %v1500_v27  ;;  %v1749_v12 = vadd.f32 %v3465_v26, %v1626_v61  ;;  %v3615_v44 = vld [vmem:[#allocation7_spill] sm:$0xff]  ;;  %v3619_v1 = vld [vmem:[#allocation10_spill] sm:$0xff] }
 0x28b   : > { %v1628_v2 = vadd.f32 %v1616_v9, %v1505_v48  ;;  %v1502_v52 = vadd.f32 %v3441_v60, %v1379_v11  ;;  %v1629_v63 = vadd.f32 %v3469_v29, %v1506_v13  ;;  %v1753_v47 = vadd.f32 %v1743_v34, %v1630_v14 }
 0x28c   : > { %v1989_v56 = vpop.f32.mrf.mxu1  ;;  %v1750_v8 = vadd.f32 %v3467_v28, %v1627_v59  ;;  %v1747_v16 = vadd.f32 %v3612_v43, %v1624_v0  ;;  %v1746_v32 = vadd.f32 %v3614_v45, %v1623_v58 }
 0x28d   : > { %v1752_v46 = vadd.f32 %v3473_v31, %v1629_v63  ;;  %v1751_v9 = vadd.f32 %v3471_v30, %v1628_v2  ;;  %v1876_v6 = vadd.f32 %v1866_v33, %v1753_v47  ;;  %v1625_v60 = vadd.f32 %v3455_v20, %v1502_v52 }
 0x28e   : > { %v1873_v22 = vadd.f32 %v3491_v19, %v1750_v8  ;;  %v1872_v20 = vadd.f32 %v3613_v17, %v1749_v12  ;;  %v3617_v19 = vld [vmem:[#allocation11_spill] sm:$0xff]  ;;  %v1869_v11 = vadd.f32 %v3618_v3, %v1746_v32 }
 0x28f   : > { %v1875_v29 = vadd.f32 %v1864_v49, %v1752_v46  ;;  %v1874_v31 = vadd.f32 %v3498_v35, %v1751_v9  ;;  %v1999_v38 = vadd.f32 %v1989_v56, %v1876_v6  ;;  %v1748_v18 = vadd.f32 %v3461_v25, %v1625_v60  ;;  %v3616_v25 = vld [vmem:[#allocation5_spill] sm:$0xff]  ;;  %v2257_v46 = vpop.permute.xlu0 %2256 }
 0x290   : > { %v1996_v35 = vadd.f32 %v3501_v50, %v1873_v22  ;;  %v1870_v41 = vadd.f32 %v3616_v25, %v1747_v16  ;;  %v3621_v50 = vld [vmem:[#allocation6_spill] sm:$0xff] }
 0x291   : > { %v1998_v30 = vadd.f32 %v1987_v39, %v1875_v29  ;;  %v1997_v28 = vadd.f32 %v3508_v5, %v1874_v31  ;;  %v1871_v26 = vadd.f32 %v3615_v44, %v1748_v18  ;;  %v1995_v39 = vadd.f32 %v3617_v19, %v1872_v20 }
 0x292   : > { %v1993_v2 = vadd.f32 %v3620_v57, %v1870_v41  ;;  %v1992_v52 = vadd.f32 %v3621_v50, %v1869_v11 }
 0x293   : > { %v1994_v13 = vadd.f32 %v3619_v1, %v1871_v26 }
 0x2a9   : > { %v3517_v51 = vpop.f32.mrf.mxu0 }
 0x2ab   : > { %v3520_v42 = vpop.f32.mrf.mxu0 }
 0x2ad   : > { %v3523_v54 = vpop.f32.mrf.mxu0 }
 0x2ae   : > { %v3525_v10 = vpop.f32.mrf.mxu1  ;;  %v2117_v59 = vadd.f32 %v3523_v54, %v1994_v13 }
 0x2af   : > { %v2102_v62 = vpop.f32.mrf.mxu0 }
 0x2b0   : > { %v3535_v21 = vpop.f32.mrf.mxu1  ;;  %v2118_v14 = vadd.f32 %v2102_v62, %v1995_v39 }
 0x2b1   : > { %v2106_v55 = vpop.f32.mrf.mxu0 }
 0x2b2   : > { %v3537_v23 = vpop.f32.mrf.mxu1  ;;  %v2119_v5 = vadd.f32 %v2106_v55, %v1996_v35  ;;  %v2115_v55 = vadd.f32 %v3517_v51, %v1992_v52  ;;  %v2248_v51 = vld [vmem:[%s3597_s2 + $0x10] sm:$0xff] }
 0x2b3   : > { %v2108_v4 = vpop.f32.mrf.mxu0 }
 0x2b4   : > { %v2225_v15 = vpop.f32.mrf.mxu1  ;;  %v2120_v48 = vadd.f32 %v2108_v4, %v1997_v28  ;;  %v2116_v4 = vadd.f32 %v3520_v42, %v1993_v2  ;;  %v2238_v54 = vadd.f32 %v3525_v10, %v2115_v55  ;;  %v2246_v42 = vld [vmem:[%s3597_s2] sm:$0xff]  ;;  %v2247_v10 = vld [vmem:[%s3597_s2 + $0x8] sm:$0xff] }
 0x2b5   : > { %v2110_v7 = vpop.f32.mrf.mxu0  ;;  %v2241_v47 = vadd.f32 %v2225_v15, %v2118_v14  ;;  %v2262_v15 = vpop.permute.xlu1 %2261 }
 0x2b6   : > { %v2229_v24 = vpop.f32.mrf.mxu1  ;;  %v2121_v56 = vadd.f32 %v2110_v7, %v1998_v30  ;;  %v2240_v7 = vadd.f32 %v3537_v23, %v2117_v59  ;;  %v2239_v62 = vadd.f32 %v3535_v21, %v2116_v4  ;;  %v3622_v21 = vmov 0.0   ;;  %v2249_v23 = vld [vmem:[%s3597_s2 + $0x18] sm:$0xff] }
 0x2b7   : > { %v2112_v53 = vpop.f32.mrf.mxu0  ;;  %v2242_v63 = vadd.f32 %v2229_v24, %v2119_v5 }
 0x2b8   : > { %v2231_v34 = vpop.f32.mrf.mxu1  ;;  %v2122_v49 = vadd.f32 %v2112_v53, %v1999_v38  ;;  %v2272_v53 = vpop.permute.xlu0 %2271 }
 0x2b9   : > { %v2243_v27 = vadd.f32 %v2231_v34, %v2120_v48  ;;  %v2267_v24 = vpop.permute.xlu1 %2266 }
 0x2ba   : > { %v2233_v33 = vpop.f32.mrf.mxu1 }
 0x2bb   : > { %v2244_v36 = vadd.f32 %v2233_v33, %v2121_v56 }
 0x2bc   : > { %v2235_v37 = vpop.f32.mrf.mxu1 }
 0x2bd   : > { %v2245_v40 = vadd.f32 %v2235_v37, %v2122_v49 }
 0x2bf   : > { %2311 = vmatprep.subr.mxu0 %v2245_v40  ;;  %2613 = vmatprep.subr.mxu1 %v2245_v40 }
 0x2c0   : > { %2312 = vmatpush1.msra.mxu0 %v2244_v36  ;;  %2617 = vmatpush1.msra.mxu1 %v2244_v36 }
 0x2c1   : > { %2313 = vmatprep.subr.mxu0 %v2243_v27  ;;  %2614 = vmatprep.subr.mxu1 %v2243_v27 }
 0x2c2   : > { %2314 = vmatpush1.msra.mxu0 %v2242_v63  ;;  %2618 = vmatpush1.msra.mxu1 %v2242_v63 }
 0x2c3   : > { %2315 = vmatprep.subr.mxu0 %v2241_v47  ;;  %2615 = vmatprep.subr.mxu1 %v2241_v47 }
 0x2c4   : > { %2316 = vmatpush1.msra.mxu0 %v2240_v7  ;;  %2619 = vmatpush1.msra.mxu1 %v2240_v7 }
 0x2c5   : > { %2317 = vmatprep.subr.mxu0 %v2239_v62  ;;  %2616 = vmatprep.subr.mxu1 %v2239_v62 }
 0x2c6   : > { %2318 = vmatpush1.msra.mxu0 %v2238_v54  ;;  %2620 = vmatpush1.msra.mxu1 %v2238_v54 }
 0x2c7   : > { %2605 = vmatmul.mubr.msk.f32.vlgmr.msra.gmra.mxu0 %vm2274_vm0, %v2246_v42  ;;  %2607 = vmatmul.mubr.msk.f32.vlgmr.msra.gmra.mxu1 %vm2274_vm0, %v2248_v51 }
 0x2c8   : > { %2357 = vmatprep.mubr.f32.mxu0 %v3622_v21  ;;  %2369 = vmatprep.mubr.f32.mxu1 %v3622_v21 }
 0x2cb   : > { %2606 = vmatmul.mubr.msk.f32.gmra.mxu0 %vm2274_vm0, %v2247_v10  ;;  %2608 = vmatmul.mubr.msk.f32.gmra.mxu1 %vm2274_vm0, %v2249_v23 }
 0x387   : > { %v2353_v0 = vpop.f32.mrf.mxu0  ;;  %v2365_v61 = vpop.f32.mrf.mxu1 }
 0x388   : > { %v2354_v9 = vadd.f32 %v2353_v0, %v2257_v46  ;;  %v2366_v6 = vadd.f32 %v2365_v61, %v2267_v24 }
 0x389   : > { %v2355_v58 = vpop.f32.mrf.mxu0  ;;  %v2367_v60 = vpop.f32.mrf.mxu1 }
 0x38a   : > { %2376 = vst [vmem:[%s217_s9] sm:$0xff] %v2354_v9  ;;  %v2356_v8 = vadd.f32 %v2355_v58, %v2257_v46  ;;  %v2368_v29 = vadd.f32 %v2367_v60, %v2267_v24  ;;  %2380 = vst [vmem:[%s217_s9 + $0x20] sm:$0xff] %v2366_v6 }
 0x38b   : > { %v2359_v34 = vpop.f32.mrf.mxu0  ;;  %v2371_v12 = vpop.f32.mrf.mxu1 }
 0x38c   : > { %2377 = vst [vmem:[%s217_s9 + $0x8] sm:$0xff] %v2356_v8  ;;  %2381 = vst [vmem:[%s217_s9 + $0x28] sm:$0xff] %v2368_v29  ;;  %v2360_v31 = vadd.f32 %v2359_v34, %v2262_v15  ;;  %v2372_v38 = vadd.f32 %v2371_v12, %v2272_v53 }
 0x38d   : > { %v2361_v18 = vpop.f32.mrf.mxu0  ;;  %v2373_v22 = vpop.f32.mrf.mxu1 }
 0x38e   : > { %2378 = vst [vmem:[%s217_s9 + $0x10] sm:$0xff] %v2360_v31  ;;  %2382 = vst [vmem:[%s217_s9 + $0x30] sm:$0xff] %v2372_v38  ;;  %v2362_v30 = vadd.f32 %v2361_v18, %v2262_v15  ;;  %v2374_v33 = vadd.f32 %v2373_v22, %v2272_v53 }
 0x390   : > { %2379 = vst [vmem:[%s217_s9 + $0x18] sm:$0xff] %v2362_v30  ;;  %2383 = vst [vmem:[%s217_s9 + $0x38] sm:$0xff] %v2374_v33 }
 0x391 PF: > { %s14_s15 = sadd.s32 1, %s2715_s15  }
 0x392   : > { %p11_p4 = scmp.ge.s32.totalorder %s14_s15, 4  }
 0x394   :  { %13 = sbr.rel (!%p11_p4) target bundleno = 1 (0x1), region = 84 }

</bundles_post_ra>
